<compile_context>
chip_gen: v6e
topology: v6e:2x2x1
jax: 0.10.0
libtpu: 0.0.40
codegen_flags: <defaults>
</compile_context>

<pallas_src>
import math

import jax
import jax.numpy as jnp
from jax import lax
from jax.experimental import pallas as pl
from jax.experimental.pallas import tpu as pltpu

F_IN, F_MID, F_OUT, NUM_ITER = 16, 32, 16, 5
F_HID = 4 * F_MID                      # 128
LN_EPS = 1e-5                          # PyTorch nn.LayerNorm default
TILE_M_MAX = 1024                      # rows per grid step


# ----------------------------- kernel helpers ------------------------------
def _norm(x):
    """LayerNorm normalization only (affine folded into following matmul)."""
    mean = jnp.mean(x, axis=-1, keepdims=True)
    var = jnp.mean((x - mean) ** 2, axis=-1, keepdims=True)
    return (x - mean) * lax.rsqrt(var + LN_EPS)


# ------------------------------ fused kernel --------------------------------
def fused_stack_kernel(x_ref,
                       in_w_ref, in_b_ref,        # (16,32),(1,32)  LN-affine folded
                       w10_ref, b10_ref,          # (32,128),(1,128) iter-0 first Linear
                       w2_ref, b2_ref,            # (5,128,128),(5,1,128)
                       wa_ref, ba_ref,            # (4,128,128),(4,1,128) fused w3@w1
                       ow_ref, ob_ref,            # (128,16),(1,16) fused w3[4]@out_proj
                       o_ref):
    # ---- input stage: relu(norm(x) @ in_w' + in_b') ----
    h = _norm(x_ref[...])
    h = jnp.maximum(
        jnp.dot(h, in_w_ref[...], preferred_element_type=jnp.float32)
        + in_b_ref[...], 0.0)

    # ---- iteration 0 (leading Linear not foldable: ReLU precedes it) ----
    t = jnp.maximum(
        jnp.dot(h, w10_ref[...], preferred_element_type=jnp.float32)
        + b10_ref[...], 0.0)
    t = jnp.maximum(
        jnp.dot(t, w2_ref[0], preferred_element_type=jnp.float32)
        + b2_ref[0], 0.0)
    t = _norm(t)

    # ---- iterations 1..4: 128x128 fused W_A (prev LN-affine + prev w3 + w1) ----
    def body(j, t):
        u = jnp.maximum(
            jnp.dot(t, wa_ref[j], preferred_element_type=jnp.float32)
            + ba_ref[j], 0.0)
        u = jnp.maximum(
            jnp.dot(u, w2_ref[j + 1], preferred_element_type=jnp.float32)
            + b2_ref[j + 1], 0.0)
        return _norm(u)

    t = lax.fori_loop(0, NUM_ITER - 1, body, t, unroll=True)

    # ---- output projection (last LN-affine + w3[4] folded in) ----
    o_ref[...] = (jnp.dot(t, ow_ref[...], preferred_element_type=jnp.float32)
                  + ob_ref[...])


# ------------------------------ pallas wrapper -------------------------------
def _full_spec(shape):
    """Whole-array VMEM block, constant across the token grid."""
    zeros = (0,) * len(shape)
    return pl.BlockSpec(shape, lambda i, _z=zeros: _z)


def _round_up(x, m):
    return -(-x // m) * m


@jax.jit
def simple_stack_forward(x, fp):
    lead = x.shape[:-1]
    n_tok = math.prod(lead) if lead else 1
    x2 = x.reshape(n_tok, F_IN)

    # Pad tokens only to a multiple of 8, then choose balanced tiles:
    # at least 2 tiles when possible (v7x dual TensorCore), capped by
    # TILE_M_MAX rows per tile.
    n8 = max(8, _round_up(n_tok, 8))
    max_tiles = n8 // 8
    n_tiles = min(max_tiles, max(2, pl.cdiv(n8, TILE_M_MAX)))
    tile_m = _round_up(pl.cdiv(n8, n_tiles), 8)
    n_pad = _round_up(n8, tile_m)
    if n_pad != n_tok:
        x2 = jnp.pad(x2, ((0, n_pad - n_tok), (0, 0)))
    grid = (n_pad // tile_m,)

    weight_args = (
        fp["in_w"], fp["in_b"],
        fp["w1_0"], fp["b1_0"],
        fp["w2"], fp["b2"],
        fp["wa"], fp["ba"],
        fp["ow"], fp["ob"],
    )

    in_specs = ([pl.BlockSpec((tile_m, F_IN), lambda i: (i, 0))]
                + [_full_spec(a.shape) for a in weight_args])
    out_spec = pl.BlockSpec((tile_m, F_OUT), lambda i: (i, 0))

    out = pl.pallas_call(
        fused_stack_kernel,
        out_shape=jax.ShapeDtypeStruct((n_pad, F_OUT), jnp.float32),
        grid=grid,
        in_specs=in_specs,
        out_specs=out_spec,
        compiler_params=pltpu.CompilerParams(
            dimension_semantics=("parallel",)),
    )(x2, *weight_args)

    return out[:n_tok].reshape(lead + (F_OUT,))


# ------------------------------ parameter init ------------------------------
def init_params(key):
    """Deterministic synthetic parameters (same shapes as the nn.Module),
    with per-iteration weights stacked along a leading NUM_ITER axis."""
    def linear(key, fan_in, fan_out):
        kw, kb = jax.random.split(key)
        bound = 1.0 / jnp.sqrt(float(fan_in))
        w = jax.random.uniform(kw, (fan_in, fan_out), jnp.float32, -bound, bound)
        b = jax.random.uniform(kb, (1, fan_out), jnp.float32, -bound, bound)
        return w, b

    keys = jax.random.split(key, 2 + NUM_ITER)
    p = {}
    p["in_norm_g"] = jnp.ones((1, F_IN), jnp.float32)
    p["in_norm_b"] = jnp.zeros((1, F_IN), jnp.float32)
    p["in_proj_w"], p["in_proj_b"] = linear(keys[0], F_IN, F_MID)
    p["out_proj_w"], p["out_proj_b"] = linear(keys[1], F_MID, F_OUT)

    w1s, b1s, w2s, b2s, gs, bts, w3s, b3s = [], [], [], [], [], [], [], []
    for i in range(NUM_ITER):
        k1, k2, k3 = jax.random.split(keys[2 + i], 3)
        w1, b1 = linear(k1, F_MID, F_HID)
        w2, b2 = linear(k2, F_HID, F_HID)
        w3, b3 = linear(k3, F_HID, F_MID)
        w1s.append(w1); b1s.append(b1)
        w2s.append(w2); b2s.append(b2)
        gs.append(jnp.ones((1, F_HID), jnp.float32))
        bts.append(jnp.zeros((1, F_HID), jnp.float32))
        w3s.append(w3); b3s.append(b3)

    p["w1"] = jnp.stack(w1s)   # (5, 32, 128)
    p["b1"] = jnp.stack(b1s)   # (5, 1, 128)
    p["w2"] = jnp.stack(w2s)   # (5, 128, 128)
    p["b2"] = jnp.stack(b2s)   # (5, 1, 128)
    p["g"] = jnp.stack(gs)     # (5, 1, 128)
    p["bt"] = jnp.stack(bts)   # (5, 1, 128)
    p["w3"] = jnp.stack(w3s)   # (5, 128, 32)
    p["b3"] = jnp.stack(b3s)   # (5, 1, 32)
    return p


def fold_params(p):
    """Pre-fold LN affines, w3->w1 chains and w3[4]->out_proj (exact in f32
    up to rounding); done once in the wrapper, outside the kernel."""
    f = {}
    # input LN affine folded into the input projection
    f["in_w"] = p["in_norm_g"].reshape(F_IN, 1) * p["in_proj_w"]       # (16,32)
    f["in_b"] = p["in_norm_b"] @ p["in_proj_w"] + p["in_proj_b"]       # (1,32)
    # iteration 0 leading Linear stays (ReLU precedes it)
    f["w1_0"] = p["w1"][0]                                             # (32,128)
    f["b1_0"] = p["b1"][0]                                             # (1,128)
    f["w2"] = p["w2"]                                                  # (5,128,128)
    f["b2"] = p["b2"]                                                  # (5,1,128)
    # W_A[j] = (g[j]-scaled w3[j]) @ w1[j+1], j = 0..3
    was, bas = [], []
    for j in range(NUM_ITER - 1):
        w3g = p["g"][j].reshape(F_HID, 1) * p["w3"][j]                 # (128,32)
        b3g = p["bt"][j] @ p["w3"][j] + p["b3"][j]                     # (1,32)
        was.append(w3g @ p["w1"][j + 1])                               # (128,128)
        bas.append(b3g @ p["w1"][j + 1] + p["b1"][j + 1])              # (1,128)
    f["wa"] = jnp.stack(was)                                           # (4,128,128)
    f["ba"] = jnp.stack(bas)                                           # (4,1,128)
    # last iteration's LN affine + w3 folded into the output projection
    j = NUM_ITER - 1
    w3g = p["g"][j].reshape(F_HID, 1) * p["w3"][j]
    b3g = p["bt"][j] @ p["w3"][j] + p["b3"][j]
    f["ow"] = w3g @ p["out_proj_w"]                                    # (128,16)
    f["ob"] = b3g @ p["out_proj_w"] + p["out_proj_b"]                  # (1,16)
    return f


# ------------------------- pure-JAX reference check --------------------------
def reference_forward(x, params):
    """Unfused reference matching the PyTorch module structure exactly."""
    def ln(x, g, b):
        m = jnp.mean(x, axis=-1, keepdims=True)
        v = jnp.mean((x - m) ** 2, axis=-1, keepdims=True)
        return (x - m) / jnp.sqrt(v + LN_EPS) * g + b

    h = jnp.maximum(ln(x, params["in_norm_g"], params["in_norm_b"])
                    @ params["in_proj_w"] + params["in_proj_b"], 0.0)
    for i in range(NUM_ITER):
        t = jnp.maximum(h @ params["w1"][i] + params["b1"][i], 0.0)
        t = jnp.maximum(t @ params["w2"][i] + params["b2"][i], 0.0)
        t = ln(t, params["g"][i], params["bt"][i])
        h = t @ params["w3"][i] + params["b3"][i]
    return h @ params["out_proj_w"] + params["out_proj_b"]


if __name__ == "__main__":
    key = jax.random.PRNGKey(0)
    kx, kp = jax.random.split(key)
    # x: (batch=2, seq=8, f_in=16)
    x = jax.random.normal(kx, (2, 8, F_IN), jnp.float32)
    params = init_params(kp)
    folded = fold_params(params)

    out = simple_stack_forward(x, folded)
    out = jax.block_until_ready(out)

    ref = reference_forward(x, params)
    assert out.shape == (2, 8, F_OUT), out.shape
    max_err = float(jnp.max(jnp.abs(out - ref)))
    assert jnp.allclose(out, ref, atol=1e-4, rtol=1e-4), max_err
    print("KERNEL_OK")
</pallas_src>

<mosaic_0001>
module attributes {stable_mosaic.version = 11 : i64} {
  func.func @fused_stack_kernel(%arg0: i32, %arg1: memref<8x16xf32, #tpu.memory_space<vmem>>, %arg2: memref<16x32xf32, #tpu.memory_space<vmem>>, %arg3: memref<1x32xf32, #tpu.memory_space<vmem>>, %arg4: memref<32x128xf32, #tpu.memory_space<vmem>>, %arg5: memref<1x128xf32, #tpu.memory_space<vmem>>, %arg6: memref<5x128x128xf32, #tpu.memory_space<vmem>>, %arg7: memref<5x1x128xf32, #tpu.memory_space<vmem>>, %arg8: memref<4x128x128xf32, #tpu.memory_space<vmem>>, %arg9: memref<4x1x128xf32, #tpu.memory_space<vmem>>, %arg10: memref<128x16xf32, #tpu.memory_space<vmem>>, %arg11: memref<1x16xf32, #tpu.memory_space<vmem>>, %arg12: memref<8x16xf32, #tpu.memory_space<vmem>>) attributes {dimension_semantics = [#tpu.dimension_semantics<parallel>], iteration_bounds = array<i64: 2>, scalar_prefetch = 0 : i64, scratch_operands = 0 : i64, tpu.core_type = #tpu.core_type<tc>, window_params = [{transform_indices = @transform_0, window_bounds = array<i64: 8, 16>}, {pipeline_mode = #tpu.pipeline_mode<synchronous>, transform_indices = @transform_1, window_bounds = array<i64: 16, 32>}, {pipeline_mode = #tpu.pipeline_mode<synchronous>, transform_indices = @transform_2, window_bounds = array<i64: 1, 32>}, {pipeline_mode = #tpu.pipeline_mode<synchronous>, transform_indices = @transform_3, window_bounds = array<i64: 32, 128>}, {pipeline_mode = #tpu.pipeline_mode<synchronous>, transform_indices = @transform_4, window_bounds = array<i64: 1, 128>}, {pipeline_mode = #tpu.pipeline_mode<synchronous>, transform_indices = @transform_5, window_bounds = array<i64: 5, 128, 128>}, {pipeline_mode = #tpu.pipeline_mode<synchronous>, transform_indices = @transform_6, window_bounds = array<i64: 5, 1, 128>}, {pipeline_mode = #tpu.pipeline_mode<synchronous>, transform_indices = @transform_7, window_bounds = array<i64: 4, 128, 128>}, {pipeline_mode = #tpu.pipeline_mode<synchronous>, transform_indices = @transform_8, window_bounds = array<i64: 4, 1, 128>}, {pipeline_mode = #tpu.pipeline_mode<synchronous>, transform_indices = @transform_9, window_bounds = array<i64: 128, 16>}, {pipeline_mode = #tpu.pipeline_mode<synchronous>, transform_indices = @transform_10, window_bounds = array<i64: 1, 16>}, {transform_indices = @transform_11, window_bounds = array<i64: 8, 16>}]} {
    %c0 = arith.constant 0 : index
    %c0_0 = arith.constant 0 : index
    %0 = vector.load %arg1[%c0, %c0_0] : memref<8x16xf32, #tpu.memory_space<vmem>>, vector<8x16xf32>
    %cst = arith.constant dense<0.000000e+00> : vector<8xf32>
    %1 = vector.multi_reduction <add>, %0, %cst [1] : vector<8x16xf32> to vector<8xf32>
    %2 = vector.shape_cast %1 : vector<8xf32> to vector<8x1xf32>
    %cst_1 = arith.constant 1.600000e+01 : f32
    %3 = vector.broadcast %cst_1 : f32 to vector<8x1xf32>
    %4 = arith.divf %2, %3 : vector<8x1xf32>
    %5 = vector.broadcast %4 : vector<8x1xf32> to vector<8x16xf32>
    %6 = arith.subf %0, %5 : vector<8x16xf32>
    %7 = arith.mulf %6, %6 : vector<8x16xf32>
    %cst_2 = arith.constant dense<0.000000e+00> : vector<8xf32>
    %8 = vector.multi_reduction <add>, %7, %cst_2 [1] : vector<8x16xf32> to vector<8xf32>
    %9 = vector.shape_cast %8 : vector<8xf32> to vector<8x1xf32>
    %cst_3 = arith.constant 1.600000e+01 : f32
    %10 = vector.broadcast %cst_3 : f32 to vector<8x1xf32>
    %11 = arith.divf %9, %10 : vector<8x1xf32>
    %12 = vector.broadcast %4 : vector<8x1xf32> to vector<8x16xf32>
    %13 = arith.subf %0, %12 : vector<8x16xf32>
    %cst_4 = arith.constant 9.99999974E-6 : f32
    %14 = vector.broadcast %cst_4 : f32 to vector<8x1xf32>
    %15 = arith.addf %11, %14 : vector<8x1xf32>
    %16 = math.rsqrt %15 : vector<8x1xf32>
    %17 = vector.broadcast %16 : vector<8x1xf32> to vector<8x16xf32>
    %18 = arith.mulf %13, %17 : vector<8x16xf32>
    %c0_5 = arith.constant 0 : index
    %c0_6 = arith.constant 0 : index
    %19 = vector.load %arg2[%c0_5, %c0_6] : memref<16x32xf32, #tpu.memory_space<vmem>>, vector<16x32xf32>
    %cst_7 = arith.constant dense<0.000000e+00> : vector<8x32xf32>
    %20 = tpu.matmul %18, %19, %cst_7 {dimension_numbers = #tpu.dot_dimension_numbers<[1], [0], [0], [1], [0, 0, 1, 1], [], []>} : vector<8x16xf32>, vector<16x32xf32>, vector<8x32xf32> -> vector<8x32xf32>
    %c0_8 = arith.constant 0 : index
    %c0_9 = arith.constant 0 : index
    %21 = vector.load %arg3[%c0_8, %c0_9] : memref<1x32xf32, #tpu.memory_space<vmem>>, vector<1x32xf32>
    %22 = vector.broadcast %21 : vector<1x32xf32> to vector<8x32xf32>
    %23 = arith.addf %20, %22 : vector<8x32xf32>
    %cst_10 = arith.constant 0.000000e+00 : f32
    %24 = vector.broadcast %cst_10 : f32 to vector<8x32xf32>
    %25 = arith.maximumf %23, %24 : vector<8x32xf32>
    %c0_11 = arith.constant 0 : index
    %c0_12 = arith.constant 0 : index
    %26 = vector.load %arg4[%c0_11, %c0_12] : memref<32x128xf32, #tpu.memory_space<vmem>>, vector<32x128xf32>
    %cst_13 = arith.constant dense<0.000000e+00> : vector<8x128xf32>
    %27 = tpu.matmul %25, %26, %cst_13 {dimension_numbers = #tpu.dot_dimension_numbers<[1], [0], [0], [1], [0, 0, 1, 1], [], []>} : vector<8x32xf32>, vector<32x128xf32>, vector<8x128xf32> -> vector<8x128xf32>
    %c0_14 = arith.constant 0 : index
    %c0_15 = arith.constant 0 : index
    %28 = vector.load %arg5[%c0_14, %c0_15] : memref<1x128xf32, #tpu.memory_space<vmem>>, vector<1x128xf32>
    %29 = vector.broadcast %28 : vector<1x128xf32> to vector<8x128xf32>
    %30 = arith.addf %27, %29 : vector<8x128xf32>
    %cst_16 = arith.constant 0.000000e+00 : f32
    %31 = vector.broadcast %cst_16 : f32 to vector<8x128xf32>
    %32 = arith.maximumf %30, %31 : vector<8x128xf32>
    %c0_17 = arith.constant 0 : index
    %c0_18 = arith.constant 0 : index
    %c0_19 = arith.constant 0 : index
    %33 = vector.load %arg6[%c0_17, %c0_18, %c0_19] : memref<5x128x128xf32, #tpu.memory_space<vmem>>, vector<1x128x128xf32>
    %34 = vector.shape_cast %33 : vector<1x128x128xf32> to vector<128x128xf32>
    %cst_20 = arith.constant dense<0.000000e+00> : vector<8x128xf32>
    %35 = tpu.matmul %32, %34, %cst_20 {dimension_numbers = #tpu.dot_dimension_numbers<[1], [0], [0], [1], [0, 0, 1, 1], [], []>} : vector<8x128xf32>, vector<128x128xf32>, vector<8x128xf32> -> vector<8x128xf32>
    %c0_21 = arith.constant 0 : index
    %c0_22 = arith.constant 0 : index
    %c0_23 = arith.constant 0 : index
    %36 = vector.load %arg7[%c0_21, %c0_22, %c0_23] : memref<5x1x128xf32, #tpu.memory_space<vmem>>, vector<1x1x128xf32>
    %37 = vector.shape_cast %36 : vector<1x1x128xf32> to vector<1x128xf32>
    %38 = vector.broadcast %37 : vector<1x128xf32> to vector<8x128xf32>
    %39 = arith.addf %35, %38 : vector<8x128xf32>
    %cst_24 = arith.constant 0.000000e+00 : f32
    %40 = vector.broadcast %cst_24 : f32 to vector<8x128xf32>
    %41 = arith.maximumf %39, %40 : vector<8x128xf32>
    %cst_25 = arith.constant dense<0.000000e+00> : vector<8xf32>
    %42 = vector.multi_reduction <add>, %41, %cst_25 [1] : vector<8x128xf32> to vector<8xf32>
    %43 = vector.shape_cast %42 : vector<8xf32> to vector<8x1xf32>
    %cst_26 = arith.constant 1.280000e+02 : f32
    %44 = vector.broadcast %cst_26 : f32 to vector<8x1xf32>
    %45 = arith.divf %43, %44 : vector<8x1xf32>
    %46 = vector.broadcast %45 : vector<8x1xf32> to vector<8x128xf32>
    %47 = arith.subf %41, %46 : vector<8x128xf32>
    %48 = arith.mulf %47, %47 : vector<8x128xf32>
    %cst_27 = arith.constant dense<0.000000e+00> : vector<8xf32>
    %49 = vector.multi_reduction <add>, %48, %cst_27 [1] : vector<8x128xf32> to vector<8xf32>
    %50 = vector.shape_cast %49 : vector<8xf32> to vector<8x1xf32>
    %cst_28 = arith.constant 1.280000e+02 : f32
    %51 = vector.broadcast %cst_28 : f32 to vector<8x1xf32>
    %52 = arith.divf %50, %51 : vector<8x1xf32>
    %53 = vector.broadcast %45 : vector<8x1xf32> to vector<8x128xf32>
    %54 = arith.subf %41, %53 : vector<8x128xf32>
    %cst_29 = arith.constant 9.99999974E-6 : f32
    %55 = vector.broadcast %cst_29 : f32 to vector<8x1xf32>
    %56 = arith.addf %52, %55 : vector<8x1xf32>
    %57 = math.rsqrt %56 : vector<8x1xf32>
    %58 = vector.broadcast %57 : vector<8x1xf32> to vector<8x128xf32>
    %59 = arith.mulf %54, %58 : vector<8x128xf32>
    %c0_i32 = arith.constant 0 : i32
    %60 = arith.index_cast %c0_i32 : i32 to index
    %c0_30 = arith.constant 0 : index
    %c0_31 = arith.constant 0 : index
    %61 = vector.load %arg8[%60, %c0_30, %c0_31] : memref<4x128x128xf32, #tpu.memory_space<vmem>>, vector<1x128x128xf32>
    %62 = vector.shape_cast %61 : vector<1x128x128xf32> to vector<128x128xf32>
    %cst_32 = arith.constant dense<0.000000e+00> : vector<8x128xf32>
    %63 = tpu.matmul %59, %62, %cst_32 {dimension_numbers = #tpu.dot_dimension_numbers<[1], [0], [0], [1], [0, 0, 1, 1], [], []>} : vector<8x128xf32>, vector<128x128xf32>, vector<8x128xf32> -> vector<8x128xf32>
    %64 = arith.index_cast %c0_i32 : i32 to index
    %c0_33 = arith.constant 0 : index
    %c0_34 = arith.constant 0 : index
    %65 = vector.load %arg9[%64, %c0_33, %c0_34] : memref<4x1x128xf32, #tpu.memory_space<vmem>>, vector<1x1x128xf32>
    %66 = vector.shape_cast %65 : vector<1x1x128xf32> to vector<1x128xf32>
    %67 = vector.broadcast %66 : vector<1x128xf32> to vector<8x128xf32>
    %68 = arith.addf %63, %67 : vector<8x128xf32>
    %cst_35 = arith.constant 0.000000e+00 : f32
    %69 = vector.broadcast %cst_35 : f32 to vector<8x128xf32>
    %70 = arith.maximumf %68, %69 : vector<8x128xf32>
    %c1_i32 = arith.constant 1 : i32
    %71 = arith.addi %c0_i32, %c1_i32 : i32
    %72 = arith.index_cast %71 : i32 to index
    %c0_36 = arith.constant 0 : index
    %c0_37 = arith.constant 0 : index
    %73 = vector.load %arg6[%72, %c0_36, %c0_37] : memref<5x128x128xf32, #tpu.memory_space<vmem>>, vector<1x128x128xf32>
    %74 = vector.shape_cast %73 : vector<1x128x128xf32> to vector<128x128xf32>
    %cst_38 = arith.constant dense<0.000000e+00> : vector<8x128xf32>
    %75 = tpu.matmul %70, %74, %cst_38 {dimension_numbers = #tpu.dot_dimension_numbers<[1], [0], [0], [1], [0, 0, 1, 1], [], []>} : vector<8x128xf32>, vector<128x128xf32>, vector<8x128xf32> -> vector<8x128xf32>
    %c1_i32_39 = arith.constant 1 : i32
    %76 = arith.addi %c0_i32, %c1_i32_39 : i32
    %77 = arith.index_cast %76 : i32 to index
    %c0_40 = arith.constant 0 : index
    %c0_41 = arith.constant 0 : index
    %78 = vector.load %arg7[%77, %c0_40, %c0_41] : memref<5x1x128xf32, #tpu.memory_space<vmem>>, vector<1x1x128xf32>
    %79 = vector.shape_cast %78 : vector<1x1x128xf32> to vector<1x128xf32>
    %80 = vector.broadcast %79 : vector<1x128xf32> to vector<8x128xf32>
    %81 = arith.addf %75, %80 : vector<8x128xf32>
    %cst_42 = arith.constant 0.000000e+00 : f32
    %82 = vector.broadcast %cst_42 : f32 to vector<8x128xf32>
    %83 = arith.maximumf %81, %82 : vector<8x128xf32>
    %cst_43 = arith.constant dense<0.000000e+00> : vector<8xf32>
    %84 = vector.multi_reduction <add>, %83, %cst_43 [1] : vector<8x128xf32> to vector<8xf32>
    %85 = vector.shape_cast %84 : vector<8xf32> to vector<8x1xf32>
    %cst_44 = arith.constant 1.280000e+02 : f32
    %86 = vector.broadcast %cst_44 : f32 to vector<8x1xf32>
    %87 = arith.divf %85, %86 : vector<8x1xf32>
    %88 = vector.broadcast %87 : vector<8x1xf32> to vector<8x128xf32>
    %89 = arith.subf %83, %88 : vector<8x128xf32>
    %90 = arith.mulf %89, %89 : vector<8x128xf32>
    %cst_45 = arith.constant dense<0.000000e+00> : vector<8xf32>
    %91 = vector.multi_reduction <add>, %90, %cst_45 [1] : vector<8x128xf32> to vector<8xf32>
    %92 = vector.shape_cast %91 : vector<8xf32> to vector<8x1xf32>
    %cst_46 = arith.constant 1.280000e+02 : f32
    %93 = vector.broadcast %cst_46 : f32 to vector<8x1xf32>
    %94 = arith.divf %92, %93 : vector<8x1xf32>
    %95 = vector.broadcast %87 : vector<8x1xf32> to vector<8x128xf32>
    %96 = arith.subf %83, %95 : vector<8x128xf32>
    %cst_47 = arith.constant 9.99999974E-6 : f32
    %97 = vector.broadcast %cst_47 : f32 to vector<8x1xf32>
    %98 = arith.addf %94, %97 : vector<8x1xf32>
    %99 = math.rsqrt %98 : vector<8x1xf32>
    %100 = vector.broadcast %99 : vector<8x1xf32> to vector<8x128xf32>
    %101 = arith.mulf %96, %100 : vector<8x128xf32>
    %c1_i32_48 = arith.constant 1 : i32
    %102 = arith.index_cast %c1_i32_48 : i32 to index
    %c0_49 = arith.constant 0 : index
    %c0_50 = arith.constant 0 : index
    %103 = vector.load %arg8[%102, %c0_49, %c0_50] : memref<4x128x128xf32, #tpu.memory_space<vmem>>, vector<1x128x128xf32>
    %104 = vector.shape_cast %103 : vector<1x128x128xf32> to vector<128x128xf32>
    %cst_51 = arith.constant dense<0.000000e+00> : vector<8x128xf32>
    %105 = tpu.matmul %101, %104, %cst_51 {dimension_numbers = #tpu.dot_dimension_numbers<[1], [0], [0], [1], [0, 0, 1, 1], [], []>} : vector<8x128xf32>, vector<128x128xf32>, vector<8x128xf32> -> vector<8x128xf32>
    %106 = arith.index_cast %c1_i32_48 : i32 to index
    %c0_52 = arith.constant 0 : index
    %c0_53 = arith.constant 0 : index
    %107 = vector.load %arg9[%106, %c0_52, %c0_53] : memref<4x1x128xf32, #tpu.memory_space<vmem>>, vector<1x1x128xf32>
    %108 = vector.shape_cast %107 : vector<1x1x128xf32> to vector<1x128xf32>
    %109 = vector.broadcast %108 : vector<1x128xf32> to vector<8x128xf32>
    %110 = arith.addf %105, %109 : vector<8x128xf32>
    %cst_54 = arith.constant 0.000000e+00 : f32
    %111 = vector.broadcast %cst_54 : f32 to vector<8x128xf32>
    %112 = arith.maximumf %110, %111 : vector<8x128xf32>
    %c1_i32_55 = arith.constant 1 : i32
    %113 = arith.addi %c1_i32_48, %c1_i32_55 : i32
    %114 = arith.index_cast %113 : i32 to index
    %c0_56 = arith.constant 0 : index
    %c0_57 = arith.constant 0 : index
    %115 = vector.load %arg6[%114, %c0_56, %c0_57] : memref<5x128x128xf32, #tpu.memory_space<vmem>>, vector<1x128x128xf32>
    %116 = vector.shape_cast %115 : vector<1x128x128xf32> to vector<128x128xf32>
    %cst_58 = arith.constant dense<0.000000e+00> : vector<8x128xf32>
    %117 = tpu.matmul %112, %116, %cst_58 {dimension_numbers = #tpu.dot_dimension_numbers<[1], [0], [0], [1], [0, 0, 1, 1], [], []>} : vector<8x128xf32>, vector<128x128xf32>, vector<8x128xf32> -> vector<8x128xf32>
    %c1_i32_59 = arith.constant 1 : i32
    %118 = arith.addi %c1_i32_48, %c1_i32_59 : i32
    %119 = arith.index_cast %118 : i32 to index
    %c0_60 = arith.constant 0 : index
    %c0_61 = arith.constant 0 : index
    %120 = vector.load %arg7[%119, %c0_60, %c0_61] : memref<5x1x128xf32, #tpu.memory_space<vmem>>, vector<1x1x128xf32>
    %121 = vector.shape_cast %120 : vector<1x1x128xf32> to vector<1x128xf32>
    %122 = vector.broadcast %121 : vector<1x128xf32> to vector<8x128xf32>
    %123 = arith.addf %117, %122 : vector<8x128xf32>
    %cst_62 = arith.constant 0.000000e+00 : f32
    %124 = vector.broadcast %cst_62 : f32 to vector<8x128xf32>
    %125 = arith.maximumf %123, %124 : vector<8x128xf32>
    %cst_63 = arith.constant dense<0.000000e+00> : vector<8xf32>
    %126 = vector.multi_reduction <add>, %125, %cst_63 [1] : vector<8x128xf32> to vector<8xf32>
    %127 = vector.shape_cast %126 : vector<8xf32> to vector<8x1xf32>
    %cst_64 = arith.constant 1.280000e+02 : f32
    %128 = vector.broadcast %cst_64 : f32 to vector<8x1xf32>
    %129 = arith.divf %127, %128 : vector<8x1xf32>
    %130 = vector.broadcast %129 : vector<8x1xf32> to vector<8x128xf32>
    %131 = arith.subf %125, %130 : vector<8x128xf32>
    %132 = arith.mulf %131, %131 : vector<8x128xf32>
    %cst_65 = arith.constant dense<0.000000e+00> : vector<8xf32>
    %133 = vector.multi_reduction <add>, %132, %cst_65 [1] : vector<8x128xf32> to vector<8xf32>
    %134 = vector.shape_cast %133 : vector<8xf32> to vector<8x1xf32>
    %cst_66 = arith.constant 1.280000e+02 : f32
    %135 = vector.broadcast %cst_66 : f32 to vector<8x1xf32>
    %136 = arith.divf %134, %135 : vector<8x1xf32>
    %137 = vector.broadcast %129 : vector<8x1xf32> to vector<8x128xf32>
    %138 = arith.subf %125, %137 : vector<8x128xf32>
    %cst_67 = arith.constant 9.99999974E-6 : f32
    %139 = vector.broadcast %cst_67 : f32 to vector<8x1xf32>
    %140 = arith.addf %136, %139 : vector<8x1xf32>
    %141 = math.rsqrt %140 : vector<8x1xf32>
    %142 = vector.broadcast %141 : vector<8x1xf32> to vector<8x128xf32>
    %143 = arith.mulf %138, %142 : vector<8x128xf32>
    %c2_i32 = arith.constant 2 : i32
    %144 = arith.index_cast %c2_i32 : i32 to index
    %c0_68 = arith.constant 0 : index
    %c0_69 = arith.constant 0 : index
    %145 = vector.load %arg8[%144, %c0_68, %c0_69] : memref<4x128x128xf32, #tpu.memory_space<vmem>>, vector<1x128x128xf32>
    %146 = vector.shape_cast %145 : vector<1x128x128xf32> to vector<128x128xf32>
    %cst_70 = arith.constant dense<0.000000e+00> : vector<8x128xf32>
    %147 = tpu.matmul %143, %146, %cst_70 {dimension_numbers = #tpu.dot_dimension_numbers<[1], [0], [0], [1], [0, 0, 1, 1], [], []>} : vector<8x128xf32>, vector<128x128xf32>, vector<8x128xf32> -> vector<8x128xf32>
    %148 = arith.index_cast %c2_i32 : i32 to index
    %c0_71 = arith.constant 0 : index
    %c0_72 = arith.constant 0 : index
    %149 = vector.load %arg9[%148, %c0_71, %c0_72] : memref<4x1x128xf32, #tpu.memory_space<vmem>>, vector<1x1x128xf32>
    %150 = vector.shape_cast %149 : vector<1x1x128xf32> to vector<1x128xf32>
    %151 = vector.broadcast %150 : vector<1x128xf32> to vector<8x128xf32>
    %152 = arith.addf %147, %151 : vector<8x128xf32>
    %cst_73 = arith.constant 0.000000e+00 : f32
    %153 = vector.broadcast %cst_73 : f32 to vector<8x128xf32>
    %154 = arith.maximumf %152, %153 : vector<8x128xf32>
    %c1_i32_74 = arith.constant 1 : i32
    %155 = arith.addi %c2_i32, %c1_i32_74 : i32
    %156 = arith.index_cast %155 : i32 to index
    %c0_75 = arith.constant 0 : index
    %c0_76 = arith.constant 0 : index
    %157 = vector.load %arg6[%156, %c0_75, %c0_76] : memref<5x128x128xf32, #tpu.memory_space<vmem>>, vector<1x128x128xf32>
    %158 = vector.shape_cast %157 : vector<1x128x128xf32> to vector<128x128xf32>
    %cst_77 = arith.constant dense<0.000000e+00> : vector<8x128xf32>
    %159 = tpu.matmul %154, %158, %cst_77 {dimension_numbers = #tpu.dot_dimension_numbers<[1], [0], [0], [1], [0, 0, 1, 1], [], []>} : vector<8x128xf32>, vector<128x128xf32>, vector<8x128xf32> -> vector<8x128xf32>
    %c1_i32_78 = arith.constant 1 : i32
    %160 = arith.addi %c2_i32, %c1_i32_78 : i32
    %161 = arith.index_cast %160 : i32 to index
    %c0_79 = arith.constant 0 : index
    %c0_80 = arith.constant 0 : index
    %162 = vector.load %arg7[%161, %c0_79, %c0_80] : memref<5x1x128xf32, #tpu.memory_space<vmem>>, vector<1x1x128xf32>
    %163 = vector.shape_cast %162 : vector<1x1x128xf32> to vector<1x128xf32>
    %164 = vector.broadcast %163 : vector<1x128xf32> to vector<8x128xf32>
    %165 = arith.addf %159, %164 : vector<8x128xf32>
    %cst_81 = arith.constant 0.000000e+00 : f32
    %166 = vector.broadcast %cst_81 : f32 to vector<8x128xf32>
    %167 = arith.maximumf %165, %166 : vector<8x128xf32>
    %cst_82 = arith.constant dense<0.000000e+00> : vector<8xf32>
    %168 = vector.multi_reduction <add>, %167, %cst_82 [1] : vector<8x128xf32> to vector<8xf32>
    %169 = vector.shape_cast %168 : vector<8xf32> to vector<8x1xf32>
    %cst_83 = arith.constant 1.280000e+02 : f32
    %170 = vector.broadcast %cst_83 : f32 to vector<8x1xf32>
    %171 = arith.divf %169, %170 : vector<8x1xf32>
    %172 = vector.broadcast %171 : vector<8x1xf32> to vector<8x128xf32>
    %173 = arith.subf %167, %172 : vector<8x128xf32>
    %174 = arith.mulf %173, %173 : vector<8x128xf32>
    %cst_84 = arith.constant dense<0.000000e+00> : vector<8xf32>
    %175 = vector.multi_reduction <add>, %174, %cst_84 [1] : vector<8x128xf32> to vector<8xf32>
    %176 = vector.shape_cast %175 : vector<8xf32> to vector<8x1xf32>
    %cst_85 = arith.constant 1.280000e+02 : f32
    %177 = vector.broadcast %cst_85 : f32 to vector<8x1xf32>
    %178 = arith.divf %176, %177 : vector<8x1xf32>
    %179 = vector.broadcast %171 : vector<8x1xf32> to vector<8x128xf32>
    %180 = arith.subf %167, %179 : vector<8x128xf32>
    %cst_86 = arith.constant 9.99999974E-6 : f32
    %181 = vector.broadcast %cst_86 : f32 to vector<8x1xf32>
    %182 = arith.addf %178, %181 : vector<8x1xf32>
    %183 = math.rsqrt %182 : vector<8x1xf32>
    %184 = vector.broadcast %183 : vector<8x1xf32> to vector<8x128xf32>
    %185 = arith.mulf %180, %184 : vector<8x128xf32>
    %c3_i32 = arith.constant 3 : i32
    %186 = arith.index_cast %c3_i32 : i32 to index
    %c0_87 = arith.constant 0 : index
    %c0_88 = arith.constant 0 : index
    %187 = vector.load %arg8[%186, %c0_87, %c0_88] : memref<4x128x128xf32, #tpu.memory_space<vmem>>, vector<1x128x128xf32>
    %188 = vector.shape_cast %187 : vector<1x128x128xf32> to vector<128x128xf32>
    %cst_89 = arith.constant dense<0.000000e+00> : vector<8x128xf32>
    %189 = tpu.matmul %185, %188, %cst_89 {dimension_numbers = #tpu.dot_dimension_numbers<[1], [0], [0], [1], [0, 0, 1, 1], [], []>} : vector<8x128xf32>, vector<128x128xf32>, vector<8x128xf32> -> vector<8x128xf32>
    %190 = arith.index_cast %c3_i32 : i32 to index
    %c0_90 = arith.constant 0 : index
    %c0_91 = arith.constant 0 : index
    %191 = vector.load %arg9[%190, %c0_90, %c0_91] : memref<4x1x128xf32, #tpu.memory_space<vmem>>, vector<1x1x128xf32>
    %192 = vector.shape_cast %191 : vector<1x1x128xf32> to vector<1x128xf32>
    %193 = vector.broadcast %192 : vector<1x128xf32> to vector<8x128xf32>
    %194 = arith.addf %189, %193 : vector<8x128xf32>
    %cst_92 = arith.constant 0.000000e+00 : f32
    %195 = vector.broadcast %cst_92 : f32 to vector<8x128xf32>
    %196 = arith.maximumf %194, %195 : vector<8x128xf32>
    %c1_i32_93 = arith.constant 1 : i32
    %197 = arith.addi %c3_i32, %c1_i32_93 : i32
    %198 = arith.index_cast %197 : i32 to index
    %c0_94 = arith.constant 0 : index
    %c0_95 = arith.constant 0 : index
    %199 = vector.load %arg6[%198, %c0_94, %c0_95] : memref<5x128x128xf32, #tpu.memory_space<vmem>>, vector<1x128x128xf32>
    %200 = vector.shape_cast %199 : vector<1x128x128xf32> to vector<128x128xf32>
    %cst_96 = arith.constant dense<0.000000e+00> : vector<8x128xf32>
    %201 = tpu.matmul %196, %200, %cst_96 {dimension_numbers = #tpu.dot_dimension_numbers<[1], [0], [0], [1], [0, 0, 1, 1], [], []>} : vector<8x128xf32>, vector<128x128xf32>, vector<8x128xf32> -> vector<8x128xf32>
    %c1_i32_97 = arith.constant 1 : i32
    %202 = arith.addi %c3_i32, %c1_i32_97 : i32
    %203 = arith.index_cast %202 : i32 to index
    %c0_98 = arith.constant 0 : index
    %c0_99 = arith.constant 0 : index
    %204 = vector.load %arg7[%203, %c0_98, %c0_99] : memref<5x1x128xf32, #tpu.memory_space<vmem>>, vector<1x1x128xf32>
    %205 = vector.shape_cast %204 : vector<1x1x128xf32> to vector<1x128xf32>
    %206 = vector.broadcast %205 : vector<1x128xf32> to vector<8x128xf32>
    %207 = arith.addf %201, %206 : vector<8x128xf32>
    %cst_100 = arith.constant 0.000000e+00 : f32
    %208 = vector.broadcast %cst_100 : f32 to vector<8x128xf32>
    %209 = arith.maximumf %207, %208 : vector<8x128xf32>
    %cst_101 = arith.constant dense<0.000000e+00> : vector<8xf32>
    %210 = vector.multi_reduction <add>, %209, %cst_101 [1] : vector<8x128xf32> to vector<8xf32>
    %211 = vector.shape_cast %210 : vector<8xf32> to vector<8x1xf32>
    %cst_102 = arith.constant 1.280000e+02 : f32
    %212 = vector.broadcast %cst_102 : f32 to vector<8x1xf32>
    %213 = arith.divf %211, %212 : vector<8x1xf32>
    %214 = vector.broadcast %213 : vector<8x1xf32> to vector<8x128xf32>
    %215 = arith.subf %209, %214 : vector<8x128xf32>
    %216 = arith.mulf %215, %215 : vector<8x128xf32>
    %cst_103 = arith.constant dense<0.000000e+00> : vector<8xf32>
    %217 = vector.multi_reduction <add>, %216, %cst_103 [1] : vector<8x128xf32> to vector<8xf32>
    %218 = vector.shape_cast %217 : vector<8xf32> to vector<8x1xf32>
    %cst_104 = arith.constant 1.280000e+02 : f32
    %219 = vector.broadcast %cst_104 : f32 to vector<8x1xf32>
    %220 = arith.divf %218, %219 : vector<8x1xf32>
    %221 = vector.broadcast %213 : vector<8x1xf32> to vector<8x128xf32>
    %222 = arith.subf %209, %221 : vector<8x128xf32>
    %cst_105 = arith.constant 9.99999974E-6 : f32
    %223 = vector.broadcast %cst_105 : f32 to vector<8x1xf32>
    %224 = arith.addf %220, %223 : vector<8x1xf32>
    %225 = math.rsqrt %224 : vector<8x1xf32>
    %226 = vector.broadcast %225 : vector<8x1xf32> to vector<8x128xf32>
    %227 = arith.mulf %222, %226 : vector<8x128xf32>
    %c4_i32 = arith.constant 4 : i32
    %c0_106 = arith.constant 0 : index
    %c0_107 = arith.constant 0 : index
    %228 = vector.load %arg10[%c0_106, %c0_107] : memref<128x16xf32, #tpu.memory_space<vmem>>, vector<128x16xf32>
    %cst_108 = arith.constant dense<0.000000e+00> : vector<8x16xf32>
    %229 = tpu.matmul %227, %228, %cst_108 {dimension_numbers = #tpu.dot_dimension_numbers<[1], [0], [0], [1], [0, 0, 1, 1], [], []>} : vector<8x128xf32>, vector<128x16xf32>, vector<8x16xf32> -> vector<8x16xf32>
    %c0_109 = arith.constant 0 : index
    %c0_110 = arith.constant 0 : index
    %230 = vector.load %arg11[%c0_109, %c0_110] : memref<1x16xf32, #tpu.memory_space<vmem>>, vector<1x16xf32>
    %231 = vector.broadcast %230 : vector<1x16xf32> to vector<8x16xf32>
    %232 = arith.addf %229, %231 : vector<8x16xf32>
    %c0_111 = arith.constant 0 : index
    %c0_112 = arith.constant 0 : index
    %233 = vector.load %arg12[%c0_111, %c0_112] : memref<8x16xf32, #tpu.memory_space<vmem>>, vector<8x16xf32>
    tpu.vector_store %arg12[%c0_111, %c0_112], %232 {strides = array<i32>} : memref<8x16xf32, #tpu.memory_space<vmem>>, vector<8x16xf32>,
    return
  }
  func.func @transform_0(%arg0: i32) -> (i32, i32) {
    %c0_i32 = arith.constant 0 : i32
    %c0_i32_0 = arith.constant 0 : i32
    return %arg0, %c0_i32 : i32, i32
  }
  func.func @transform_1(%arg0: i32) -> (i32, i32) {
    %c0_i32 = arith.constant 0 : i32
    %c0_i32_0 = arith.constant 0 : i32
    %c0_i32_1 = arith.constant 0 : i32
    return %c0_i32, %c0_i32_0 : i32, i32
  }
  func.func @transform_2(%arg0: i32) -> (i32, i32) {
    %c0_i32 = arith.constant 0 : i32
    %c0_i32_0 = arith.constant 0 : i32
    %c0_i32_1 = arith.constant 0 : i32
    return %c0_i32, %c0_i32_0 : i32, i32
  }
  func.func @transform_3(%arg0: i32) -> (i32, i32) {
    %c0_i32 = arith.constant 0 : i32
    %c0_i32_0 = arith.constant 0 : i32
    %c0_i32_1 = arith.constant 0 : i32
    return %c0_i32, %c0_i32_0 : i32, i32
  }
  func.func @transform_4(%arg0: i32) -> (i32, i32) {
    %c0_i32 = arith.constant 0 : i32
    %c0_i32_0 = arith.constant 0 : i32
    %c0_i32_1 = arith.constant 0 : i32
    return %c0_i32, %c0_i32_0 : i32, i32
  }
  func.func @transform_5(%arg0: i32) -> (i32, i32, i32) {
    %c0_i32 = arith.constant 0 : i32
    %c0_i32_0 = arith.constant 0 : i32
    %c0_i32_1 = arith.constant 0 : i32
    %c0_i32_2 = arith.constant 0 : i32
    return %c0_i32, %c0_i32_0, %c0_i32_1 : i32, i32, i32
  }
  func.func @transform_6(%arg0: i32) -> (i32, i32, i32) {
    %c0_i32 = arith.constant 0 : i32
    %c0_i32_0 = arith.constant 0 : i32
    %c0_i32_1 = arith.constant 0 : i32
    %c0_i32_2 = arith.constant 0 : i32
    return %c0_i32, %c0_i32_0, %c0_i32_1 : i32, i32, i32
  }
  func.func @transform_7(%arg0: i32) -> (i32, i32, i32) {
    %c0_i32 = arith.constant 0 : i32
    %c0_i32_0 = arith.constant 0 : i32
    %c0_i32_1 = arith.constant 0 : i32
    %c0_i32_2 = arith.constant 0 : i32
    return %c0_i32, %c0_i32_0, %c0_i32_1 : i32, i32, i32
  }
  func.func @transform_8(%arg0: i32) -> (i32, i32, i32) {
    %c0_i32 = arith.constant 0 : i32
    %c0_i32_0 = arith.constant 0 : i32
    %c0_i32_1 = arith.constant 0 : i32
    %c0_i32_2 = arith.constant 0 : i32
    return %c0_i32, %c0_i32_0, %c0_i32_1 : i32, i32, i32
  }
  func.func @transform_9(%arg0: i32) -> (i32, i32) {
    %c0_i32 = arith.constant 0 : i32
    %c0_i32_0 = arith.constant 0 : i32
    %c0_i32_1 = arith.constant 0 : i32
    return %c0_i32, %c0_i32_0 : i32, i32
  }
  func.func @transform_10(%arg0: i32) -> (i32, i32) {
    %c0_i32 = arith.constant 0 : i32
    %c0_i32_0 = arith.constant 0 : i32
    %c0_i32_1 = arith.constant 0 : i32
    return %c0_i32, %c0_i32_0 : i32, i32
  }
  func.func @transform_11(%arg0: i32) -> (i32, i32) {
    %c0_i32 = arith.constant 0 : i32
    %c0_i32_0 = arith.constant 0 : i32
    return %arg0, %c0_i32 : i32, i32
  }
}

</mosaic_0001>

<bundles_post_ra>
// kernel: simple_stack_forward.1
= control target key start
LH: loop header
LB: loop body
LE: loop exit
PB: predicated region body
PF: predicated region fallthrough
CT: control target
= control target key end

     0   :  { %s2998_s0 = inlined_call_operand.vmem [shape: f32[16,16], index: 0, kind: input, shape index: {}]   ;;  %s2999_s1 = inlined_call_operand.vmem [shape: f32[16,32], index: 1, kind: input, shape index: {}]   ;;  %s3000_s2 = inlined_call_operand.vmem [shape: f32[1,32], index: 2, kind: input, shape index: {}]   ;;  %s3001_s3 = inlined_call_operand.vmem [shape: f32[32,128], index: 3, kind: input, shape index: {}]   ;;  %s3002_s4 = inlined_call_operand.vmem [shape: f32[1,128], index: 4, kind: input, shape index: {}]   ;;  %s3003_s5 = inlined_call_operand.hbm [shape: f32[5,128,128], index: 5, kind: input, shape index: {}]   ;;  %s3004_s6 = inlined_call_operand.vmem [shape: f32[5,1,128], index: 6, kind: input, shape index: {}]   ;;  %s3005_s7 = inlined_call_operand.hbm [shape: f32[4,128,128], index: 7, kind: input, shape index: {}]   ;;  %s3006_s8 = inlined_call_operand.vmem [shape: f32[4,1,128], index: 8, kind: input, shape index: {}]   ;;  %s3007_s9 = inlined_call_operand.vmem [shape: f32[128,16], index: 9, kind: input, shape index: {}]   ;;  %s3008_s10 = inlined_call_operand.vmem [shape: f32[1,16], index: 10, kind: input, shape index: {}]   ;;  %s3009_s11 = inlined_call_operand.hbm [shape: f32[16,16], index: 11, kind: output, shape index: {}]  }
   0x1   :  { %3011 = sst [smem:[#allocation12_spill]] %s2998_s0 }
   0x2   :  { %16 = vsyncpa [#allocation3], 0 }
   0x3   :  { %17 = vsyncpa [#allocation6], 0 }
   0x4   :  { %18 = vsyncpa [#allocation4], 0 }
   0x5   :  { %20 = vsyncpa [#allocation4 + $0x1], 0  ;;  %s2548_s17 = smov 0   ;;  %s2550_s18 = smov 0  }
   0x6   :  { %s2552_s19 = smov 0   ;;  %s2554_s20 = smov 0  }
   0x7 LB: > { %s2569_s21 = sadd.s32 4294967295, %s2479_s20   ;;  %s1702_s22 = sadd.s32 4294967294, %s2479_s20   ;;  %s2479_s20 = sphi %s2554_s20, %s3027_s20   ;;  %s2475_s19 = sphi %s2552_s19, %s3026_s19   ;;  %s2471_s18 = sphi %s2550_s18, %s3025_s18   ;;  %s2467_s17 = sphi %s2548_s17, %s3024_s17  }
   0x8   : > { %s2573_s23 = sadd.s32 1, %s2479_s20   ;;  %s269_s24 = sadd.s32 1, %s2475_s19 }
   0x9   : > { %s266_s25 = ssub.s32 %s2479_s20, %s2573_s23  ;;  %p279_p0 = scmp.ne.s32.totalorder %s2475_s19, %s2471_s18 }
   0xa   : > { %p267_p1 = scmp.eq.s32.totalorder %s266_s25, 0  ;;  %p280_p2 = scmp.eq.s32.totalorder %s2569_s21, 1 }
   0xb   : > { %p285_p3 = scmp.ne.s32.totalorder %s2471_s18, %s2467_s17  ;;  %p286_p4 = scmp.eq.s32.totalorder %s1702_s22, 1 }
   0xc   : > { %s2584_s26 = scalar_select %p267_p1, %s2475_s19, %s269_s24  }
   0xd   : > { %p2586_p5 = por %p280_p2, %p279_p0  ;;  %p2590_p6 = por %p286_p4, %p285_p3 }
   0xe   : > { %3012 = sst [smem:[#allocation11_spill]] %s2584_s26  ;;  %p1703_p7 = scmp.ge.s32.totalorder %s2479_s20, 1 }
   0xf   : > { %s3014_s28 = scalar_select %p2590_p6, 1, 0 }
  0x10   : > { %p293_p8 = scmp.lt.s32.totalorder %s2479_s20, 3  ;;  %p3010_p9 = scmp.eq.s32.totalorder %s2569_s21, 0 }
  0x11   : > { %s2481_s30 = smov [#allocation2]   ;;  %s2482_s14 = smov [#allocation5]  }
  0x12   : > { %p2597_p10 = pnand %p1703_p7, %p293_p8  ;;  %s317_s12 = sshll.u32 %s2481_s30, 4  ;;  %s318_s12 = int_to_ptr.vmem [resolvable:$true] %s317_s12 }
  0x13   : > { %s333_s15 = sshll.u32 %s2482_s14, 4  ;;  %s2370_s16 = scalar_lea.vmem %s318_s12, 10240  ;;  %s334_s15 = int_to_ptr.vmem [resolvable:$true] %s333_s15 }
  0x14   : > { %p2293_p11 = pneg %p2597_p10  ;;  %p2371_p0 = scmp.ne.s32.totalorder %s318_s12, %s2370_s16 }
  0x15   : > { %p2378_p3 = scmp.lt.s32.totalorder %s318_s12, %s318_s12  ;;  %p2379_p4 = scmp.lt.s32.totalorder %s2370_s16, %s2370_s16 }
  0x16   : > { %p2605_p12 = pnand %p3010_p9, %p2293_p11 }
  0x17   : > { %p2380_p7 = por %p2379_p4, %p2378_p3 }
  0x18   : > { %p2361_p13 = pneg %p2605_p12 }
  0x1a   : > { %p2373_p1 = pnand %p2371_p0, %p2361_p13 }
  0x1c   : > { %p2374_p2 = pneg %p2373_p1 }
  0x1e   : > { %p2381_p8 = pnand %p2380_p7, %p2374_p2 }
  0x20   : > { %2384 = shalt.err (!%p2381_p8)
}
  0x21   : > { %s2483_s22 = smov 128   ;;  %s2484_s24 = smov 8  }
  0x22   : > { %2296 = dma.hbm_to_vmem [thread:$0]  (!%p2605_p12), %s3003_s5, 10240, %s318_s12, [#allocation3], %s2483_s22, %s2483_s22, %s2484_s24  }
  0x23   : > { %s2396_s14 = scalar_lea.vmem %s334_s15, 8192  ;;  %p2404_p9 = scmp.lt.s32.totalorder %s334_s15, %s334_s15 }
  0x24   : > { %p2397_p11 = scmp.ne.s32.totalorder %s334_s15, %s2396_s14  ;;  %p2405_p6 = scmp.lt.s32.totalorder %s2396_s14, %s2396_s14 }
  0x26   : > { %p2399_p0 = pnand %p2397_p11, %p2361_p13  ;;  %p2406_p3 = por %p2405_p6, %p2404_p9 }
  0x28   : > { %p2400_p1 = pneg %p2399_p0 }
  0x2a   : > { %p2407_p2 = pnand %p2406_p3, %p2400_p1 }
  0x2c   : > { %2410 = shalt.err (!%p2407_p2)
}
  0x2d   : > { %2299 = dma.hbm_to_vmem [thread:$0]  (!%p2605_p12), %s3005_s7, 8192, %s334_s15, [#allocation6], %s2483_s22, %s2483_s22, %s2484_s24  }
  0x2e   : > { %365 = sbr.rel (%p2597_p10) target bundleno = 4252 (0x109c), region = 64  ;;  %p3017_p4 = scmp.eq.s32.totalorder (!%p2597_p10), %s2569_s21, 0 }
  0x33   : > { %2454 = dma.done.wait (%p3017_p4), [#allocation3], 10240   ;;  %p3018_p13 = pmov %p3017_p4 }
  0x34   : > { %p3019_p7 = pmov %p3017_p4 }
  0x35   : > { %2456 = vsyncadd (%p3018_p13), [#allocation3], 4294957056 }
  0x36   : > { %2458 = dma.done.wait (%p3019_p7), [#allocation6], 8192   ;;  %p3020_p6 = pmov %p3017_p4 }
  0x37   : > { %p408_p9 = scmp.lt.s32.totalorder %s2569_s21, 1  ;;  %s3021_s0 = sld [smem:[#allocation12_spill]]  ;;  %vm413_vm0 = vcmask 130048   ;;  %v429_v7 = vld [vmem:[%s2999_s1 + $0x8] sm:$0xff]  ;;  %v2485_v8 = vmov 0.0   ;;  %v428_v9 = vld [vmem:[%s2999_s1] sm:$0xff] }
  0x38   : > { %2460 = vsyncadd (%p3020_p6), [#allocation6], 4294959104  ;;  %1915 = vmatprep.subr.mxu0 %v2485_v8  ;;  %vm2486_vm1 = vmmov 0   ;;  %1922 = vmatprep.subr.mxu1 %v2485_v8  ;;  %v514_v10 = vld [vmem:[%s3001_s3 + $0x18] sm:$0xff]  ;;  %v513_v16 = vld [vmem:[%s3001_s3 + $0x10] sm:$0xff]  ;;  %vm522_vm2 = vcmask 261120  }
  0x39   : > { %s409_s26 = scalar_select %p408_p9, %s2569_s21, 1  ;;  %1919 = vmatprep.mubr.msk.f32.mxu0 %vm2486_vm1, %v2485_v8  ;;  %1916 = vmatpush3.msra.mxu0 %v429_v7  ;;  %v512_v17 = vld [vmem:[%s3001_s3 + $0x8] sm:$0xff]  ;;  %v511_v18 = vld [vmem:[%s3001_s3] sm:$0xff]  ;;  %v612_v19 = vld [vmem:[#allocation2 + $0x78] sm:$0xff] }
  0x3a   : > { %1917 = vmatprep.subr.mxu0 %v2485_v8  ;;  %1930 = vmatprep.mubr.msk.f32.mxu1 %vm2486_vm1, %v2485_v8  ;;  %v611_v20 = vld [vmem:[#allocation2 + $0x70] sm:$0xff]  ;;  %v610_v21 = vld [vmem:[#allocation2 + $0x68] sm:$0xff]  ;;  %v609_v22 = vld [vmem:[#allocation2 + $0x60] sm:$0xff]  ;;  %s405_s22 = sand.u32 1, %s2471_s18   ;;  %s1734_s14 = sshll.u32 %s2569_s21, 7 }
  0x3b   : > { %s1711_s12 = sshll.u32 %s409_s26, 3  ;;  %1918 = vmatpush3.msra.mxu0 %v428_v9  ;;  %1923 = vmatpush3.msra.mxu1 %v514_v10  ;;  %v608_v23 = vld [vmem:[#allocation2 + $0x58] sm:$0xff]  ;;  %v607_v24 = vld [vmem:[#allocation2 + $0x50] sm:$0xff]  ;;  %v606_v25 = vld [vmem:[#allocation2 + $0x48] sm:$0xff]  ;;  %s1710_s24 = sshll.u32 %s405_s22, 3 }
  0x3c   : > { %1933 = vmatprep.subr.mxu0 %v2485_v8  ;;  %1924 = vmatprep.subr.mxu1 %v2485_v8  ;;  %v605_v26 = vld [vmem:[#allocation2 + $0x40] sm:$0xff]  ;;  %v604_v27 = vld [vmem:[#allocation2 + $0x38] sm:$0xff]  ;;  %v603_v28 = vld [vmem:[#allocation2 + $0x30] sm:$0xff]  ;;  %s407_s16 = scalar_lea.vmem [#allocation7], %s1710_s24  ;;  %s2962_s29 = scalar_lea.hbm %s3009_s11, %s1734_s14 }
  0x3d   : > { %s411_s15 = scalar_lea.vmem %s3021_s0, %s1711_s12  ;;  %1925 = vmatpush3.msra.mxu1 %v513_v16  ;;  %v602_v29 = vld [vmem:[#allocation2 + $0x28] sm:$0xff]  ;;  %v601_v30 = vld [vmem:[#allocation2 + $0x20] sm:$0xff]  ;;  %v600_v31 = vld [vmem:[#allocation2 + $0x18] sm:$0xff]  ;;  %s1621_s26 = sshll.u32 %s407_s16, 4  ;;  %s1622_s26 = int_to_ptr.vmem [resolvable:$true] %s1621_s26 }
  0x3e   : > { %v412_v0 = vld [vmem:[%s411_s15] sm:$0xff]  ;;  %1926 = vmatprep.subr.mxu1 %v2485_v8  ;;  %v599_v37 = vld [vmem:[#allocation2 + $0x10] sm:$0xff]  ;;  %v598_v38 = vld [vmem:[#allocation2 + $0x8] sm:$0xff]  ;;  %s1608_s15 = scalar_lea.sflag [#allocation4], %s405_s22  ;;  %s2411_s0 = scalar_lea.vmem %s1622_s26, 128 }
  0x3f   : > { %v414_v1 = vsel %vm413_vm0, %v412_v0, 0.0  ;;  %1927 = vmatpush3.msra.mxu1 %v512_v17  ;;  %v1712_v32 = vld [vmem:[%s3000_s2] ss:$0 sm:$0xff]  ;;  %v718_v50 = vld [vmem:[#allocation5 + $0x78] sm:$0xff]  ;;  %v717_v51 = vld [vmem:[#allocation5 + $0x70] sm:$0xff]  ;;  %p2412_p10 = scmp.ne.s32.totalorder %s1622_s26, %s2411_s0  ;;  %s2487_s21 = smov [#allocation7]  }
  0x40   : > { %415 = vadd.xlane.f32.xlu0 %v414_v1  ;;  %1928 = vmatprep.subr.mxu1 %v2485_v8  ;;  %v597_v39 = vld [vmem:[#allocation2] sm:$0xff]  ;;  %v716_v52 = vld [vmem:[#allocation5 + $0x68] sm:$0xff]  ;;  %v714_v54 = vld [vmem:[#allocation5 + $0x58] sm:$0xff]  ;;  %s2415_s24 = sshll.u32 %s2487_s21, 4  ;;  %s2416_s24 = int_to_ptr.vmem [resolvable:$false] %s2415_s24 }
  0x41   : > { %1929 = vmatpush3.msra.mxu1 %v511_v18  ;;  %v1714_v40 = vld [vmem:[%s3002_s4] ss:$0 sm:$0xff]  ;;  %v713_v55 = vld [vmem:[#allocation5 + $0x50] sm:$0xff]  ;;  %v712_v60 = vld [vmem:[#allocation5 + $0x48] sm:$0xff]  ;;  %p2413_p12 = pnand %p2412_p10, %p2586_p5  ;;  %s2417_s25 = scalar_lea.vmem %s2416_s24, 256 }
  0x42   : > { %1968 = vmatprep.subr.mxu1 %v2485_v8  ;;  %v1716_v45 = vld [vmem:[%s3004_s6] ss:$0 sm:$0xff]  ;;  %v710_v62 = vld [vmem:[#allocation5 + $0x38] sm:$0xff]  ;;  %v709_v63 = vld [vmem:[#allocation5 + $0x30] sm:$0xff]  ;;  %p2418_p11 = scmp.lt.s32.totalorder %s1622_s26, %s2416_s24  ;;  %p2419_p0 = scmp.lt.s32.totalorder %s2417_s25, %s2411_s0 }
  0x43   : > { %v715_v53 = vld [vmem:[#allocation5 + $0x60] sm:$0xff]  ;;  %v812_v7 = vld [vmem:[#allocation2 + $0xf0] sm:$0xff]  ;;  %v811_v9 = vld [vmem:[#allocation2 + $0xe8] sm:$0xff]  ;;  %p2414_p8 = pneg %p2413_p12 }
  0x44   : > { %v711_v61 = vld [vmem:[#allocation5 + $0x40] sm:$0xff]  ;;  %v804_v16 = vld [vmem:[#allocation2 + $0xb0] sm:$0xff]  ;;  %v803_v17 = vld [vmem:[#allocation2 + $0xa8] sm:$0xff]  ;;  %p2420_p1 = por %p2419_p0, %p2418_p11 }
  0x45   : > { %v707_v1 = vld [vmem:[#allocation5 + $0x20] sm:$0xff] }
  0x46   : > { %v810_v10 = vld [vmem:[#allocation2 + $0xe0] sm:$0xff]  ;;  %p2421_p3 = pnand %p2420_p1, %p2414_p8 }
  0x47   : > { %v802_v18 = vld [vmem:[#allocation2 + $0xa0] sm:$0xff] }
  0xc9   : > { %v416_v2 = vpop.xlane.xlu0 %415 }
  0xca   : > { %v418_v3 = vmul.f32 0.0625, %v416_v2  ;;  %v706_v2 = vld [vmem:[#allocation5 + $0x18] sm:$0xff] }
  0xcc   : > { %v419_v4 = vsub.f32 %v412_v0, %v418_v3  ;;  %v708_v0 = vld [vmem:[#allocation5 + $0x28] sm:$0xff]  ;;  %v705_v3 = vld [vmem:[#allocation5 + $0x10] sm:$0xff] }
  0xce   : > { %v420_v5 = vmul.f32 %v419_v4, %v419_v4 }
  0xd0   : > { %v421_v6 = vsel %vm413_vm0, %v420_v5, 0.0  ;;  %v703_v5 = vld [vmem:[#allocation5] sm:$0xff] }
  0xd1   : > { %422 = vadd.xlane.f32.xlu0 %v421_v6  ;;  %v813_v6 = vld [vmem:[#allocation2 + $0xf8] sm:$0xff] }
 0x15a   : > { %v423_v11 = vpop.xlane.xlu0 %422 }
 0x15b   : > { %v424_v12 = vmul.f32 0.0625, %v423_v11  ;;  %v809_v11 = vld [vmem:[#allocation2 + $0xd8] sm:$0xff] }
 0x15d   : > { %v425_v13 = vadd.f32 1e-05, %v424_v12  ;;  %v808_v12 = vld [vmem:[#allocation2 + $0xd0] sm:$0xff] }
 0x15f   : > { %2347 = vrsqrt.f32 %v425_v13  ;;  %v807_v13 = vld [vmem:[#allocation2 + $0xc8] sm:$0xff] }
 0x16c   : > { %v2348_v14 = vpop.eup %2347 }
 0x16d   : > { %v427_v15 = vmul.f32 %v2348_v14, %v419_v4  ;;  %v704_v4 = vld [vmem:[#allocation5 + $0x8] sm:$0xff]  ;;  %v806_v14 = vld [vmem:[#allocation2 + $0xc0] sm:$0xff] }
 0x16f   : > { %1920 = vmatmul.mubr.msk.f32.vlgmr.msra.gmra.mxu0 %vm413_vm0, %v427_v15  ;;  %v805_v15 = vld [vmem:[#allocation2 + $0xb8] sm:$0xff] }
 0x170   : > { %1965 = vmatprep.mubr.msk.f32.mxu0 %vm2486_vm1, %v2485_v8  ;;  %1934 = vmatpush3.msra.mxu0 %v612_v19  ;;  %v801_v19 = vld [vmem:[#allocation2 + $0x98] sm:$0xff] }
 0x171   : > { %1935 = vmatprep.subr.mxu0 %v2485_v8 }
 0x172   : > { %1936 = vmatpush3.msra.mxu0 %v611_v20 }
 0x173   : > { %1937 = vmatprep.subr.mxu0 %v2485_v8 }
 0x174   : > { %1938 = vmatpush3.msra.mxu0 %v610_v21 }
 0x175   : > { %1939 = vmatprep.subr.mxu0 %v2485_v8 }
 0x176   : > { %1940 = vmatpush3.msra.mxu0 %v609_v22 }
 0x177   : > { %1941 = vmatprep.subr.mxu0 %v2485_v8 }
 0x178   : > { %1942 = vmatpush3.msra.mxu0 %v608_v23 }
 0x179   : > { %1943 = vmatprep.subr.mxu0 %v2485_v8 }
 0x17a   : > { %1944 = vmatpush3.msra.mxu0 %v607_v24 }
 0x17b   : > { %1945 = vmatprep.subr.mxu0 %v2485_v8 }
 0x17c   : > { %1946 = vmatpush3.msra.mxu0 %v606_v25  ;;  %v800_v25 = vld [vmem:[#allocation2 + $0x90] sm:$0xff] }
 0x17d   : > { %1947 = vmatprep.subr.mxu0 %v2485_v8 }
 0x17e   : > { %1948 = vmatpush3.msra.mxu0 %v605_v26  ;;  %v799_v26 = vld [vmem:[#allocation2 + $0x88] sm:$0xff] }
 0x17f   : > { %1949 = vmatprep.subr.mxu0 %v2485_v8 }
 0x180   : > { %1950 = vmatpush3.msra.mxu0 %v604_v27  ;;  %v798_v27 = vld [vmem:[#allocation2 + $0x80] sm:$0xff] }
 0x181   : > { %1951 = vmatprep.subr.mxu0 %v2485_v8 }
 0x182   : > { %1952 = vmatpush3.msra.mxu0 %v603_v28  ;;  %v1717_v28 = vld [vmem:[%s3006_s8] ss:$0 sm:$0xff] }
 0x183   : > { %1953 = vmatprep.subr.mxu0 %v2485_v8 }
 0x184   : > { %1954 = vmatpush3.msra.mxu0 %v602_v29 }
 0x185   : > { %1955 = vmatprep.subr.mxu0 %v2485_v8 }
 0x186   : > { %1956 = vmatpush3.msra.mxu0 %v601_v30 }
 0x187   : > { %1957 = vmatprep.subr.mxu0 %v2485_v8 }
 0x188   : > { %1958 = vmatpush3.msra.mxu0 %v600_v31 }
 0x189   : > { %1959 = vmatprep.subr.mxu0 %v2485_v8 }
 0x18a   : > { %1960 = vmatpush3.msra.mxu0 %v599_v37 }
 0x18b   : > { %1961 = vmatprep.subr.mxu0 %v2485_v8 }
 0x18c   : > { %1962 = vmatpush3.msra.mxu0 %v598_v38  ;;  %v920_v38 = vld [vmem:[#allocation5 + $0xf8] sm:$0xff] }
 0x18d   : > { %1963 = vmatprep.subr.mxu0 %v2485_v8 }
 0x18e   : > { %1964 = vmatpush3.msra.mxu0 %v597_v39  ;;  %v919_v39 = vld [vmem:[#allocation5 + $0xf0] sm:$0xff] }
 0x18f   : > { %2003 = vmatprep.subr.mxu0 %v2485_v8 }
 0x22f   : > { %v506_v33 = vpop.f32.mrf.mxu0 }
 0x230   : > { %v507_v34 = vadd.f32 %v1712_v32, %v506_v33  ;;  %v1719_v33 = vld [vmem:[%s3004_s6 + $0x1] ss:$0 sm:$0xff] }
 0x231   : > { %v1921_v35 = vpop.f32.mrf.mxu0 }
 0x232   : > { %v510_v36 = vmax.f32 %v507_v34, 0.0 }
 0x234   : > { %1931 = vmatmul.mubr.msk.f32.vlgmr.msra.gmra.mxu1 %vm522_vm2, %v510_v36 }
 0x235   : > { %2000 = vmatprep.mubr.msk.f32.mxu1 %vm2486_vm1, %v2485_v8  ;;  %1969 = vmatpush3.msra.mxu1 %v718_v50  ;;  %v912_v50 = vld [vmem:[#allocation5 + $0xb8] sm:$0xff] }
 0x236   : > { %1970 = vmatprep.subr.mxu1 %v2485_v8 }
 0x237   : > { %1971 = vmatpush3.msra.mxu1 %v717_v51  ;;  %v911_v51 = vld [vmem:[#allocation5 + $0xb0] sm:$0xff] }
 0x238   : > { %1972 = vmatprep.subr.mxu1 %v2485_v8 }
 0x239   : > { %1973 = vmatpush3.msra.mxu1 %v716_v52  ;;  %v910_v52 = vld [vmem:[#allocation5 + $0xa8] sm:$0xff] }
 0x23a   : > { %1974 = vmatprep.subr.mxu1 %v2485_v8 }
 0x23b   : > { %1975 = vmatpush3.msra.mxu1 %v715_v53  ;;  %v909_v53 = vld [vmem:[#allocation5 + $0xa0] sm:$0xff] }
 0x23c   : > { %1976 = vmatprep.subr.mxu1 %v2485_v8 }
 0x23d   : > { %1977 = vmatpush3.msra.mxu1 %v714_v54  ;;  %v908_v54 = vld [vmem:[#allocation5 + $0x98] sm:$0xff] }
 0x23e   : > { %1978 = vmatprep.subr.mxu1 %v2485_v8 }
 0x23f   : > { %1979 = vmatpush3.msra.mxu1 %v713_v55  ;;  %v907_v55 = vld [vmem:[#allocation5 + $0x90] sm:$0xff] }
 0x240   : > { %1980 = vmatprep.subr.mxu1 %v2485_v8 }
 0x241   : > { %1981 = vmatpush3.msra.mxu1 %v712_v60  ;;  %v1014_v60 = vld [vmem:[#allocation2 + $0x168] sm:$0xff] }
 0x242   : > { %1982 = vmatprep.subr.mxu1 %v2485_v8 }
 0x243   : > { %1983 = vmatpush3.msra.mxu1 %v711_v61  ;;  %v1013_v61 = vld [vmem:[#allocation2 + $0x160] sm:$0xff] }
 0x244   : > { %1984 = vmatprep.subr.mxu1 %v2485_v8 }
 0x245   : > { %1985 = vmatpush3.msra.mxu1 %v710_v62  ;;  %v1012_v62 = vld [vmem:[#allocation2 + $0x158] sm:$0xff] }
 0x246   : > { %1986 = vmatprep.subr.mxu1 %v2485_v8 }
 0x247   : > { %1987 = vmatpush3.msra.mxu1 %v709_v63  ;;  %v1011_v63 = vld [vmem:[#allocation2 + $0x150] sm:$0xff] }
 0x248   : > { %1988 = vmatprep.subr.mxu1 %v2485_v8 }
 0x249   : > { %1989 = vmatpush3.msra.mxu1 %v708_v0  ;;  %v1010_v0 = vld [vmem:[#allocation2 + $0x148] sm:$0xff] }
 0x24a   : > { %1990 = vmatprep.subr.mxu1 %v2485_v8 }
 0x24b   : > { %1991 = vmatpush3.msra.mxu1 %v707_v1  ;;  %v1009_v1 = vld [vmem:[#allocation2 + $0x140] sm:$0xff] }
 0x24c   : > { %1992 = vmatprep.subr.mxu1 %v2485_v8 }
 0x24d   : > { %1993 = vmatpush3.msra.mxu1 %v706_v2  ;;  %v1008_v2 = vld [vmem:[#allocation2 + $0x138] sm:$0xff] }
 0x24e   : > { %1994 = vmatprep.subr.mxu1 %v2485_v8 }
 0x24f   : > { %1995 = vmatpush3.msra.mxu1 %v705_v3  ;;  %v1007_v3 = vld [vmem:[#allocation2 + $0x130] sm:$0xff] }
 0x250   : > { %1996 = vmatprep.subr.mxu1 %v2485_v8 }
 0x251   : > { %1997 = vmatpush3.msra.mxu1 %v704_v4  ;;  %v1006_v4 = vld [vmem:[#allocation2 + $0x128] sm:$0xff] }
 0x252   : > { %1998 = vmatprep.subr.mxu1 %v2485_v8 }
 0x253   : > { %1999 = vmatpush3.msra.mxu1 %v703_v5  ;;  %v1005_v5 = vld [vmem:[#allocation2 + $0x120] sm:$0xff] }
 0x254   : > { %2038 = vmatprep.subr.mxu1 %v2485_v8 }
 0x2f4   : > { %v592_v41 = vpop.f32.mrf.mxu1 }
 0x2f5   : > { %v593_v42 = vadd.f32 %v1714_v40, %v592_v41  ;;  %v918_v40 = vld [vmem:[#allocation5 + $0xe8] sm:$0xff]  ;;  %v917_v41 = vld [vmem:[#allocation5 + $0xe0] sm:$0xff] }
 0x2f6   : > { %v1932_v43 = vpop.f32.mrf.mxu1 }
 0x2f7   : > { %v596_v44 = vmax.f32 %v593_v42, 0.0  ;;  %v916_v42 = vld [vmem:[#allocation5 + $0xd8] sm:$0xff]  ;;  %v915_v43 = vld [vmem:[#allocation5 + $0xd0] sm:$0xff] }
 0x2f9   : > { %1966 = vmatmul.mubr.f32.vlgmr.msra.gmra.mxu0 %v596_v44 }
 0x2fa   : > { %2035 = vmatprep.mubr.msk.f32.mxu0 %vm2486_vm1, %v2485_v8  ;;  %2004 = vmatpush3.msra.mxu0 %v813_v6  ;;  %v1004_v6 = vld [vmem:[#allocation2 + $0x118] sm:$0xff] }
 0x2fb   : > { %2005 = vmatprep.subr.mxu0 %v2485_v8 }
 0x2fc   : > { %2006 = vmatpush3.msra.mxu0 %v812_v7 }
 0x2fd   : > { %2007 = vmatprep.subr.mxu0 %v2485_v8 }
 0x2fe   : > { %2008 = vmatpush3.msra.mxu0 %v811_v9 }
 0x2ff   : > { %2009 = vmatprep.subr.mxu0 %v2485_v8 }
 0x300   : > { %2010 = vmatpush3.msra.mxu0 %v810_v10 }
 0x301   : > { %2011 = vmatprep.subr.mxu0 %v2485_v8 }
 0x302   : > { %2012 = vmatpush3.msra.mxu0 %v809_v11 }
 0x303   : > { %2013 = vmatprep.subr.mxu0 %v2485_v8 }
 0x304   : > { %2014 = vmatpush3.msra.mxu0 %v808_v12 }
 0x305   : > { %2015 = vmatprep.subr.mxu0 %v2485_v8 }
 0x306   : > { %2016 = vmatpush3.msra.mxu0 %v807_v13  ;;  %v1003_v13 = vld [vmem:[#allocation2 + $0x110] sm:$0xff] }
 0x307   : > { %2017 = vmatprep.subr.mxu0 %v2485_v8 }
 0x308   : > { %2018 = vmatpush3.msra.mxu0 %v806_v14  ;;  %v1002_v14 = vld [vmem:[#allocation2 + $0x108] sm:$0xff] }
 0x309   : > { %2019 = vmatprep.subr.mxu0 %v2485_v8 }
 0x30a   : > { %2020 = vmatpush3.msra.mxu0 %v805_v15  ;;  %v1001_v15 = vld [vmem:[#allocation2 + $0x100] sm:$0xff] }
 0x30b   : > { %2021 = vmatprep.subr.mxu0 %v2485_v8 }
 0x30c   : > { %2022 = vmatpush3.msra.mxu0 %v804_v16  ;;  %v1721_v16 = vld [vmem:[%s3006_s8 + $0x1] ss:$0 sm:$0xff] }
 0x30d   : > { %2023 = vmatprep.subr.mxu0 %v2485_v8 }
 0x30e   : > { %2024 = vmatpush3.msra.mxu0 %v803_v17 }
 0x30f   : > { %2025 = vmatprep.subr.mxu0 %v2485_v8 }
 0x310   : > { %2026 = vmatpush3.msra.mxu0 %v802_v18 }
 0x311   : > { %2027 = vmatprep.subr.mxu0 %v2485_v8 }
 0x312   : > { %2028 = vmatpush3.msra.mxu0 %v801_v19 }
 0x313   : > { %2029 = vmatprep.subr.mxu0 %v2485_v8 }
 0x314   : > { %2030 = vmatpush3.msra.mxu0 %v800_v25 }
 0x315   : > { %2031 = vmatprep.subr.mxu0 %v2485_v8 }
 0x316   : > { %2032 = vmatpush3.msra.mxu0 %v799_v26  ;;  %v1123_v26 = vld [vmem:[#allocation5 + $0x178] sm:$0xff] }
 0x317   : > { %2033 = vmatprep.subr.mxu0 %v2485_v8 }
 0x318   : > { %2034 = vmatpush3.msra.mxu0 %v798_v27  ;;  %v1122_v27 = vld [vmem:[#allocation5 + $0x170] sm:$0xff] }
 0x319   : > { %2073 = vmatprep.subr.mxu0 %v2485_v8 }
 0x3b9   : > { %v686_v46 = vpop.f32.mrf.mxu0 }
 0x3ba   : > { %v687_v47 = vadd.f32 %v1716_v45, %v686_v46 }
 0x3bb   : > { %v1967_v48 = vpop.f32.mrf.mxu0 }
 0x3bc   : > { %v690_v49 = vmax.f32 %v687_v47, 0.0  ;;  %v914_v48 = vld [vmem:[#allocation5 + $0xc8] sm:$0xff] }
 0x3be   : > { %691 = vadd.xlane.f32.xlu1 %v690_v49 }
 0x447   : > { %v692_v56 = vpop.xlane.xlu1 %691 }
 0x448   : > { %v694_v57 = vmul.f32 0.0078125, %v692_v56  ;;  %v906_v56 = vld [vmem:[#allocation5 + $0x88] sm:$0xff] }
 0x44a   : > { %v2712_v58 = vsub.f32 %v690_v49, %v694_v57  ;;  %v913_v49 = vld [vmem:[#allocation5 + $0xc0] sm:$0xff] }
 0x44b   : > { %v905_v57 = vld [vmem:[#allocation5 + $0x80] sm:$0xff] }
 0x44c   : > { %v696_v59 = vmul.f32 %v2712_v58, %v2712_v58 }
 0x44e   : > { %697 = vadd.xlane.f32.xlu1 %v696_v59  ;;  %v1015_v59 = vld [vmem:[#allocation2 + $0x170] sm:$0xff] }
 0x4d7   : > { %v698_v20 = vpop.xlane.xlu1 %697 }
 0x4d8   : > { %v699_v21 = vmul.f32 0.0078125, %v698_v20 }
 0x4da   : > { %v700_v22 = vadd.f32 1e-05, %v699_v21  ;;  %v1723_v21 = vld [vmem:[%s3004_s6 + $0x2] ss:$0 sm:$0xff] }
 0x4dc   : > { %2349 = vrsqrt.f32 %v700_v22 }
 0x4e9   : > { %v2350_v23 = vpop.eup %2349 }
 0x4ea   : > { %v702_v24 = vmul.f32 %v2350_v23, %v2712_v58  ;;  %v1016_v58 = vld [vmem:[#allocation2 + $0x178] sm:$0xff] }
 0x4ec   : > { %2001 = vmatmul.mubr.f32.vlgmr.msra.gmra.mxu1 %v702_v24 }
 0x4ed   : > { %2070 = vmatprep.mubr.msk.f32.mxu1 %vm2486_vm1, %v2485_v8  ;;  %2039 = vmatpush3.msra.mxu1 %v920_v38  ;;  %v1115_v38 = vld [vmem:[#allocation5 + $0x138] sm:$0xff] }
 0x4ee   : > { %2040 = vmatprep.subr.mxu1 %v2485_v8 }
 0x4ef   : > { %2041 = vmatpush3.msra.mxu1 %v919_v39  ;;  %v1114_v39 = vld [vmem:[#allocation5 + $0x130] sm:$0xff] }
 0x4f0   : > { %2042 = vmatprep.subr.mxu1 %v2485_v8 }
 0x4f1   : > { %2043 = vmatpush3.msra.mxu1 %v918_v40  ;;  %v1113_v40 = vld [vmem:[#allocation5 + $0x128] sm:$0xff] }
 0x4f2   : > { %2044 = vmatprep.subr.mxu1 %v2485_v8 }
 0x4f3   : > { %2045 = vmatpush3.msra.mxu1 %v917_v41  ;;  %v1112_v41 = vld [vmem:[#allocation5 + $0x120] sm:$0xff] }
 0x4f4   : > { %2046 = vmatprep.subr.mxu1 %v2485_v8 }
 0x4f5   : > { %2047 = vmatpush3.msra.mxu1 %v916_v42  ;;  %v1111_v42 = vld [vmem:[#allocation5 + $0x118] sm:$0xff] }
 0x4f6   : > { %2048 = vmatprep.subr.mxu1 %v2485_v8 }
 0x4f7   : > { %2049 = vmatpush3.msra.mxu1 %v915_v43  ;;  %v1110_v43 = vld [vmem:[#allocation5 + $0x110] sm:$0xff] }
 0x4f8   : > { %2050 = vmatprep.subr.mxu1 %v2485_v8 }
 0x4f9   : > { %2051 = vmatpush3.msra.mxu1 %v914_v48  ;;  %v1217_v48 = vld [vmem:[#allocation2 + $0x1e8] sm:$0xff] }
 0x4fa   : > { %2052 = vmatprep.subr.mxu1 %v2485_v8 }
 0x4fb   : > { %2053 = vmatpush3.msra.mxu1 %v913_v49  ;;  %v1216_v49 = vld [vmem:[#allocation2 + $0x1e0] sm:$0xff] }
 0x4fc   : > { %2054 = vmatprep.subr.mxu1 %v2485_v8 }
 0x4fd   : > { %2055 = vmatpush3.msra.mxu1 %v912_v50  ;;  %v1215_v50 = vld [vmem:[#allocation2 + $0x1d8] sm:$0xff] }
 0x4fe   : > { %2056 = vmatprep.subr.mxu1 %v2485_v8 }
 0x4ff   : > { %2057 = vmatpush3.msra.mxu1 %v911_v51  ;;  %v1214_v51 = vld [vmem:[#allocation2 + $0x1d0] sm:$0xff] }
 0x500   : > { %2058 = vmatprep.subr.mxu1 %v2485_v8 }
 0x501   : > { %2059 = vmatpush3.msra.mxu1 %v910_v52  ;;  %v1213_v52 = vld [vmem:[#allocation2 + $0x1c8] sm:$0xff] }
 0x502   : > { %2060 = vmatprep.subr.mxu1 %v2485_v8 }
 0x503   : > { %2061 = vmatpush3.msra.mxu1 %v909_v53  ;;  %v1212_v53 = vld [vmem:[#allocation2 + $0x1c0] sm:$0xff] }
 0x504   : > { %2062 = vmatprep.subr.mxu1 %v2485_v8 }
 0x505   : > { %2063 = vmatpush3.msra.mxu1 %v908_v54  ;;  %v1211_v54 = vld [vmem:[#allocation2 + $0x1b8] sm:$0xff] }
 0x506   : > { %2064 = vmatprep.subr.mxu1 %v2485_v8 }
 0x507   : > { %2065 = vmatpush3.msra.mxu1 %v907_v55  ;;  %v1210_v55 = vld [vmem:[#allocation2 + $0x1b0] sm:$0xff] }
 0x508   : > { %2066 = vmatprep.subr.mxu1 %v2485_v8 }
 0x509   : > { %2067 = vmatpush3.msra.mxu1 %v906_v56  ;;  %v1209_v56 = vld [vmem:[#allocation2 + $0x1a8] sm:$0xff] }
 0x50a   : > { %2068 = vmatprep.subr.mxu1 %v2485_v8 }
 0x50b   : > { %2069 = vmatpush3.msra.mxu1 %v905_v57  ;;  %v1208_v57 = vld [vmem:[#allocation2 + $0x1a0] sm:$0xff] }
 0x50c   : > { %2108 = vmatprep.subr.mxu1 %v2485_v8 }
 0x5ac   : > { %v792_v29 = vpop.f32.mrf.mxu1 }
 0x5ad   : > { %v793_v30 = vadd.f32 %v1717_v28, %v792_v29  ;;  %v1121_v28 = vld [vmem:[#allocation5 + $0x168] sm:$0xff]  ;;  %v1120_v29 = vld [vmem:[#allocation5 + $0x160] sm:$0xff] }
 0x5ae   : > { %v2002_v31 = vpop.f32.mrf.mxu1 }
 0x5af   : > { %v796_v32 = vmax.f32 %v793_v30, 0.0  ;;  %v1119_v30 = vld [vmem:[#allocation5 + $0x158] sm:$0xff]  ;;  %v1118_v31 = vld [vmem:[#allocation5 + $0x150] sm:$0xff] }
 0x5b1   : > { %2036 = vmatmul.mubr.f32.vlgmr.msra.gmra.mxu0 %v796_v32 }
 0x5b2   : > { %2105 = vmatprep.mubr.msk.f32.mxu0 %vm2486_vm1, %v2485_v8  ;;  %2074 = vmatpush3.msra.mxu0 %v1016_v58  ;;  %v1207_v58 = vld [vmem:[#allocation2 + $0x198] sm:$0xff] }
 0x5b3   : > { %2075 = vmatprep.subr.mxu0 %v2485_v8 }
 0x5b4   : > { %2076 = vmatpush3.msra.mxu0 %v1015_v59 }
 0x5b5   : > { %2077 = vmatprep.subr.mxu0 %v2485_v8 }
 0x5b6   : > { %2078 = vmatpush3.msra.mxu0 %v1014_v60 }
 0x5b7   : > { %2079 = vmatprep.subr.mxu0 %v2485_v8 }
 0x5b8   : > { %2080 = vmatpush3.msra.mxu0 %v1013_v61 }
 0x5b9   : > { %2081 = vmatprep.subr.mxu0 %v2485_v8 }
 0x5ba   : > { %2082 = vmatpush3.msra.mxu0 %v1012_v62 }
 0x5bb   : > { %2083 = vmatprep.subr.mxu0 %v2485_v8 }
 0x5bc   : > { %2084 = vmatpush3.msra.mxu0 %v1011_v63 }
 0x5bd   : > { %2085 = vmatprep.subr.mxu0 %v2485_v8 }
 0x5be   : > { %2086 = vmatpush3.msra.mxu0 %v1010_v0  ;;  %v1206_v0 = vld [vmem:[#allocation2 + $0x190] sm:$0xff] }
 0x5bf   : > { %2087 = vmatprep.subr.mxu0 %v2485_v8 }
 0x5c0   : > { %2088 = vmatpush3.msra.mxu0 %v1009_v1  ;;  %v1205_v1 = vld [vmem:[#allocation2 + $0x188] sm:$0xff] }
 0x5c1   : > { %2089 = vmatprep.subr.mxu0 %v2485_v8 }
 0x5c2   : > { %2090 = vmatpush3.msra.mxu0 %v1008_v2  ;;  %v1204_v2 = vld [vmem:[#allocation2 + $0x180] sm:$0xff] }
 0x5c3   : > { %2091 = vmatprep.subr.mxu0 %v2485_v8 }
 0x5c4   : > { %2092 = vmatpush3.msra.mxu0 %v1007_v3  ;;  %v1725_v3 = vld [vmem:[%s3006_s8 + $0x2] ss:$0 sm:$0xff] }
 0x5c5   : > { %2093 = vmatprep.subr.mxu0 %v2485_v8 }
 0x5c6   : > { %2094 = vmatpush3.msra.mxu0 %v1006_v4 }
 0x5c7   : > { %2095 = vmatprep.subr.mxu0 %v2485_v8 }
 0x5c8   : > { %2096 = vmatpush3.msra.mxu0 %v1005_v5 }
 0x5c9   : > { %2097 = vmatprep.subr.mxu0 %v2485_v8 }
 0x5ca   : > { %2098 = vmatpush3.msra.mxu0 %v1004_v6 }
 0x5cb   : > { %2099 = vmatprep.subr.mxu0 %v2485_v8 }
 0x5cc   : > { %2100 = vmatpush3.msra.mxu0 %v1003_v13 }
 0x5cd   : > { %2101 = vmatprep.subr.mxu0 %v2485_v8 }
 0x5ce   : > { %2102 = vmatpush3.msra.mxu0 %v1002_v14  ;;  %v1326_v14 = vld [vmem:[#allocation5 + $0x1f8] sm:$0xff] }
 0x5cf   : > { %2103 = vmatprep.subr.mxu0 %v2485_v8 }
 0x5d0   : > { %2104 = vmatpush3.msra.mxu0 %v1001_v15  ;;  %v1325_v15 = vld [vmem:[#allocation5 + $0x1f0] sm:$0xff] }
 0x5d1   : > { %2143 = vmatprep.subr.mxu0 %v2485_v8 }
 0x671   : > { %v888_v34 = vpop.f32.mrf.mxu0 }
 0x672   : > { %v889_v35 = vadd.f32 %v1719_v33, %v888_v34 }
 0x673   : > { %v2037_v36 = vpop.f32.mrf.mxu0 }
 0x674   : > { %v892_v37 = vmax.f32 %v889_v35, 0.0  ;;  %v1117_v36 = vld [vmem:[#allocation5 + $0x148] sm:$0xff] }
 0x676   : > { %893 = vadd.xlane.f32.xlu0 %v892_v37 }
 0x6ff   : > { %v894_v44 = vpop.xlane.xlu0 %893 }
 0x700   : > { %v895_v45 = vmul.f32 0.0078125, %v894_v44  ;;  %v1109_v44 = vld [vmem:[#allocation5 + $0x108] sm:$0xff] }
 0x702   : > { %v2759_v46 = vsub.f32 %v892_v37, %v895_v45  ;;  %v1116_v37 = vld [vmem:[#allocation5 + $0x140] sm:$0xff] }
 0x703   : > { %v1108_v45 = vld [vmem:[#allocation5 + $0x100] sm:$0xff] }
 0x704   : > { %v897_v47 = vmul.f32 %v2759_v46, %v2759_v46 }
 0x706   : > { %898 = vadd.xlane.f32.xlu1 %v897_v47  ;;  %v1218_v47 = vld [vmem:[#allocation2 + $0x1f0] sm:$0xff] }
 0x78f   : > { %v899_v7 = vpop.xlane.xlu1 %898 }
 0x790   : > { %v900_v9 = vmul.f32 0.0078125, %v899_v7 }
 0x792   : > { %v901_v10 = vadd.f32 1e-05, %v900_v9  ;;  %v1727_v9 = vld [vmem:[%s3004_s6 + $0x3] ss:$0 sm:$0xff] }
 0x794   : > { %2351 = vrsqrt.f32 %v901_v10 }
 0x7a1   : > { %v2352_v11 = vpop.eup %2351 }
 0x7a2   : > { %v903_v12 = vmul.f32 %v2352_v11, %v2759_v46  ;;  %v1219_v46 = vld [vmem:[#allocation2 + $0x1f8] sm:$0xff] }
 0x7a4   : > { %2071 = vmatmul.mubr.f32.vlgmr.msra.gmra.mxu1 %v903_v12 }
 0x7a5   : > { %2140 = vmatprep.mubr.msk.f32.mxu1 %vm2486_vm1, %v2485_v8  ;;  %2109 = vmatpush3.msra.mxu1 %v1123_v26  ;;  %v1318_v26 = vld [vmem:[#allocation5 + $0x1b8] sm:$0xff] }
 0x7a6   : > { %2110 = vmatprep.subr.mxu1 %v2485_v8 }
 0x7a7   : > { %2111 = vmatpush3.msra.mxu1 %v1122_v27  ;;  %v1317_v27 = vld [vmem:[#allocation5 + $0x1b0] sm:$0xff] }
 0x7a8   : > { %2112 = vmatprep.subr.mxu1 %v2485_v8 }
 0x7a9   : > { %2113 = vmatpush3.msra.mxu1 %v1121_v28  ;;  %v1316_v28 = vld [vmem:[#allocation5 + $0x1a8] sm:$0xff] }
 0x7aa   : > { %2114 = vmatprep.subr.mxu1 %v2485_v8 }
 0x7ab   : > { %2115 = vmatpush3.msra.mxu1 %v1120_v29  ;;  %v1315_v29 = vld [vmem:[#allocation5 + $0x1a0] sm:$0xff] }
 0x7ac   : > { %2116 = vmatprep.subr.mxu1 %v2485_v8 }
 0x7ad   : > { %2117 = vmatpush3.msra.mxu1 %v1119_v30  ;;  %v1314_v30 = vld [vmem:[#allocation5 + $0x198] sm:$0xff] }
 0x7ae   : > { %2118 = vmatprep.subr.mxu1 %v2485_v8 }
 0x7af   : > { %2119 = vmatpush3.msra.mxu1 %v1118_v31  ;;  %v1313_v31 = vld [vmem:[#allocation5 + $0x190] sm:$0xff] }
 0x7b0   : > { %2120 = vmatprep.subr.mxu1 %v2485_v8 }
 0x7b1   : > { %2121 = vmatpush3.msra.mxu1 %v1117_v36  ;;  %v1420_v36 = vld [vmem:[#allocation2 + $0x268] sm:$0xff] }
 0x7b2   : > { %2122 = vmatprep.subr.mxu1 %v2485_v8 }
 0x7b3   : > { %2123 = vmatpush3.msra.mxu1 %v1116_v37  ;;  %v1419_v37 = vld [vmem:[#allocation2 + $0x260] sm:$0xff] }
 0x7b4   : > { %2124 = vmatprep.subr.mxu1 %v2485_v8 }
 0x7b5   : > { %2125 = vmatpush3.msra.mxu1 %v1115_v38  ;;  %v1418_v38 = vld [vmem:[#allocation2 + $0x258] sm:$0xff] }
 0x7b6   : > { %2126 = vmatprep.subr.mxu1 %v2485_v8 }
 0x7b7   : > { %2127 = vmatpush3.msra.mxu1 %v1114_v39  ;;  %v1417_v39 = vld [vmem:[#allocation2 + $0x250] sm:$0xff] }
 0x7b8   : > { %2128 = vmatprep.subr.mxu1 %v2485_v8 }
 0x7b9   : > { %2129 = vmatpush3.msra.mxu1 %v1113_v40  ;;  %v1416_v40 = vld [vmem:[#allocation2 + $0x248] sm:$0xff] }
 0x7ba   : > { %2130 = vmatprep.subr.mxu1 %v2485_v8 }
 0x7bb   : > { %2131 = vmatpush3.msra.mxu1 %v1112_v41  ;;  %v1415_v41 = vld [vmem:[#allocation2 + $0x240] sm:$0xff] }
 0x7bc   : > { %2132 = vmatprep.subr.mxu1 %v2485_v8 }
 0x7bd   : > { %2133 = vmatpush3.msra.mxu1 %v1111_v42  ;;  %v1414_v42 = vld [vmem:[#allocation2 + $0x238] sm:$0xff] }
 0x7be   : > { %2134 = vmatprep.subr.mxu1 %v2485_v8 }
 0x7bf   : > { %2135 = vmatpush3.msra.mxu1 %v1110_v43  ;;  %v1413_v43 = vld [vmem:[#allocation2 + $0x230] sm:$0xff] }
 0x7c0   : > { %2136 = vmatprep.subr.mxu1 %v2485_v8 }
 0x7c1   : > { %2137 = vmatpush3.msra.mxu1 %v1109_v44  ;;  %v1412_v44 = vld [vmem:[#allocation2 + $0x228] sm:$0xff] }
 0x7c2   : > { %2138 = vmatprep.subr.mxu1 %v2485_v8 }
 0x7c3   : > { %2139 = vmatpush3.msra.mxu1 %v1108_v45  ;;  %v1411_v45 = vld [vmem:[#allocation2 + $0x220] sm:$0xff] }
 0x7c4   : > { %2178 = vmatprep.subr.mxu1 %v2485_v8 }
 0x864   : > { %v995_v17 = vpop.f32.mrf.mxu1 }
 0x865   : > { %v996_v18 = vadd.f32 %v1721_v16, %v995_v17  ;;  %v1324_v16 = vld [vmem:[#allocation5 + $0x1e8] sm:$0xff]  ;;  %v1323_v17 = vld [vmem:[#allocation5 + $0x1e0] sm:$0xff] }
 0x866   : > { %v2072_v19 = vpop.f32.mrf.mxu1 }
 0x867   : > { %v999_v20 = vmax.f32 %v996_v18, 0.0  ;;  %v1322_v18 = vld [vmem:[#allocation5 + $0x1d8] sm:$0xff]  ;;  %v1321_v19 = vld [vmem:[#allocation5 + $0x1d0] sm:$0xff] }
 0x869   : > { %2106 = vmatmul.mubr.f32.vlgmr.msra.gmra.mxu0 %v999_v20 }
 0x86a   : > { %2175 = vmatprep.mubr.msk.f32.mxu0 %vm2486_vm1, %v2485_v8  ;;  %2144 = vmatpush3.msra.mxu0 %v1219_v46  ;;  %v1410_v46 = vld [vmem:[#allocation2 + $0x218] sm:$0xff] }
 0x86b   : > { %2145 = vmatprep.subr.mxu0 %v2485_v8 }
 0x86c   : > { %2146 = vmatpush3.msra.mxu0 %v1218_v47 }
 0x86d   : > { %2147 = vmatprep.subr.mxu0 %v2485_v8 }
 0x86e   : > { %2148 = vmatpush3.msra.mxu0 %v1217_v48 }
 0x86f   : > { %2149 = vmatprep.subr.mxu0 %v2485_v8 }
 0x870   : > { %2150 = vmatpush3.msra.mxu0 %v1216_v49 }
 0x871   : > { %2151 = vmatprep.subr.mxu0 %v2485_v8 }
 0x872   : > { %2152 = vmatpush3.msra.mxu0 %v1215_v50 }
 0x873   : > { %2153 = vmatprep.subr.mxu0 %v2485_v8 }
 0x874   : > { %2154 = vmatpush3.msra.mxu0 %v1214_v51 }
 0x875   : > { %2155 = vmatprep.subr.mxu0 %v2485_v8 }
 0x876   : > { %2156 = vmatpush3.msra.mxu0 %v1213_v52  ;;  %v1409_v52 = vld [vmem:[#allocation2 + $0x210] sm:$0xff] }
 0x877   : > { %2157 = vmatprep.subr.mxu0 %v2485_v8 }
 0x878   : > { %2158 = vmatpush3.msra.mxu0 %v1212_v53  ;;  %v1408_v53 = vld [vmem:[#allocation2 + $0x208] sm:$0xff] }
 0x879   : > { %2159 = vmatprep.subr.mxu0 %v2485_v8 }
 0x87a   : > { %2160 = vmatpush3.msra.mxu0 %v1211_v54  ;;  %v1407_v54 = vld [vmem:[#allocation2 + $0x200] sm:$0xff] }
 0x87b   : > { %2161 = vmatprep.subr.mxu0 %v2485_v8 }
 0x87c   : > { %2162 = vmatpush3.msra.mxu0 %v1210_v55  ;;  %v1729_v55 = vld [vmem:[%s3006_s8 + $0x3] ss:$0 sm:$0xff] }
 0x87d   : > { %2163 = vmatprep.subr.mxu0 %v2485_v8 }
 0x87e   : > { %2164 = vmatpush3.msra.mxu0 %v1209_v56 }
 0x87f   : > { %2165 = vmatprep.subr.mxu0 %v2485_v8 }
 0x880   : > { %2166 = vmatpush3.msra.mxu0 %v1208_v57 }
 0x881   : > { %2167 = vmatprep.subr.mxu0 %v2485_v8 }
 0x882   : > { %2168 = vmatpush3.msra.mxu0 %v1207_v58 }
 0x883   : > { %2169 = vmatprep.subr.mxu0 %v2485_v8 }
 0x884   : > { %2170 = vmatpush3.msra.mxu0 %v1206_v0 }
 0x885   : > { %2171 = vmatprep.subr.mxu0 %v2485_v8 }
 0x886   : > { %2172 = vmatpush3.msra.mxu0 %v1205_v1  ;;  %v1528_v1 = vld [vmem:[%s3007_s9 + $0x78] sm:$0xff] }
 0x887   : > { %2173 = vmatprep.subr.mxu0 %v2485_v8 }
 0x888   : > { %2174 = vmatpush3.msra.mxu0 %v1204_v2  ;;  %v1527_v2 = vld [vmem:[%s3007_s9 + $0x70] sm:$0xff] }
 0x889   : > { %2213 = vmatprep.subr.mxu0 %v2485_v8 }
 0x929   : > { %v1091_v22 = vpop.f32.mrf.mxu0 }
 0x92a   : > { %v1092_v23 = vadd.f32 %v1723_v21, %v1091_v22 }
 0x92b   : > { %v2107_v24 = vpop.f32.mrf.mxu0 }
 0x92c   : > { %v1095_v25 = vmax.f32 %v1092_v23, 0.0  ;;  %v1320_v24 = vld [vmem:[#allocation5 + $0x1c8] sm:$0xff] }
 0x92e   : > { %1096 = vadd.xlane.f32.xlu0 %v1095_v25 }
 0x9b7   : > { %v1097_v32 = vpop.xlane.xlu0 %1096 }
 0x9b8   : > { %v1098_v33 = vmul.f32 0.0078125, %v1097_v32  ;;  %v1312_v32 = vld [vmem:[#allocation5 + $0x188] sm:$0xff] }
 0x9ba   : > { %v2806_v34 = vsub.f32 %v1095_v25, %v1098_v33  ;;  %v1319_v25 = vld [vmem:[#allocation5 + $0x1c0] sm:$0xff] }
 0x9bb   : > { %v1311_v33 = vld [vmem:[#allocation5 + $0x180] sm:$0xff] }
 0x9bc   : > { %v1100_v35 = vmul.f32 %v2806_v34, %v2806_v34 }
 0x9be   : > { %1101 = vadd.xlane.f32.xlu1 %v1100_v35  ;;  %v1421_v35 = vld [vmem:[#allocation2 + $0x270] sm:$0xff] }
 0xa47   : > { %v1102_v59 = vpop.xlane.xlu1 %1101 }
 0xa48   : > { %v1103_v60 = vmul.f32 0.0078125, %v1102_v59 }
 0xa4a   : > { %v1104_v61 = vadd.f32 1e-05, %v1103_v60  ;;  %v1731_v60 = vld [vmem:[%s3004_s6 + $0x4] ss:$0 sm:$0xff] }
 0xa4c   : > { %2353 = vrsqrt.f32 %v1104_v61 }
 0xa59   : > { %v2354_v62 = vpop.eup %2353 }
 0xa5a   : > { %v1106_v63 = vmul.f32 %v2354_v62, %v2806_v34  ;;  %v1422_v34 = vld [vmem:[#allocation2 + $0x278] sm:$0xff] }
 0xa5c   : > { %2141 = vmatmul.mubr.f32.vlgmr.msra.gmra.mxu1 %v1106_v63 }
 0xa5d   : > { %2210 = vmatprep.mubr.msk.f32.mxu1 %vm2486_vm1, %v2485_v8  ;;  %2179 = vmatpush3.msra.mxu1 %v1326_v14  ;;  %v1520_v14 = vld [vmem:[%s3007_s9 + $0x38] sm:$0xff] }
 0xa5e   : > { %2180 = vmatprep.subr.mxu1 %v2485_v8 }
 0xa5f   : > { %2181 = vmatpush3.msra.mxu1 %v1325_v15  ;;  %v1519_v15 = vld [vmem:[%s3007_s9 + $0x30] sm:$0xff] }
 0xa60   : > { %2182 = vmatprep.subr.mxu1 %v2485_v8 }
 0xa61   : > { %2183 = vmatpush3.msra.mxu1 %v1324_v16  ;;  %v1518_v16 = vld [vmem:[%s3007_s9 + $0x28] sm:$0xff] }
 0xa62   : > { %2184 = vmatprep.subr.mxu1 %v2485_v8 }
 0xa63   : > { %2185 = vmatpush3.msra.mxu1 %v1323_v17  ;;  %v1517_v17 = vld [vmem:[%s3007_s9 + $0x20] sm:$0xff] }
 0xa64   : > { %2186 = vmatprep.subr.mxu1 %v2485_v8 }
 0xa65   : > { %2187 = vmatpush3.msra.mxu1 %v1322_v18  ;;  %v1516_v18 = vld [vmem:[%s3007_s9 + $0x18] sm:$0xff] }
 0xa66   : > { %2188 = vmatprep.subr.mxu1 %v2485_v8 }
 0xa67   : > { %2189 = vmatpush3.msra.mxu1 %v1321_v19  ;;  %v1515_v19 = vld [vmem:[%s3007_s9 + $0x10] sm:$0xff] }
 0xa68   : > { %2190 = vmatprep.subr.mxu1 %v2485_v8 }
 0xa69   : > { %2191 = vmatpush3.msra.mxu1 %v1320_v24 }
 0xa6a   : > { %2192 = vmatprep.subr.mxu1 %v2485_v8 }
 0xa6b   : > { %2193 = vmatpush3.msra.mxu1 %v1319_v25 }
 0xa6c   : > { %2194 = vmatprep.subr.mxu1 %v2485_v8 }
 0xa6d   : > { %2195 = vmatpush3.msra.mxu1 %v1318_v26 }
 0xa6e   : > { %2196 = vmatprep.subr.mxu1 %v2485_v8 }
 0xa6f   : > { %2197 = vmatpush3.msra.mxu1 %v1317_v27  ;;  %v1732_v27 = vld [vmem:[%s3008_s10] ss:$0 sm:$0xff] }
 0xa70   : > { %2198 = vmatprep.subr.mxu1 %v2485_v8 }
 0xa71   : > { %2199 = vmatpush3.msra.mxu1 %v1316_v28 }
 0xa72   : > { %2200 = vmatprep.subr.mxu1 %v2485_v8 }
 0xa73   : > { %2201 = vmatpush3.msra.mxu1 %v1315_v29 }
 0xa74   : > { %2202 = vmatprep.subr.mxu1 %v2485_v8 }
 0xa75   : > { %2203 = vmatpush3.msra.mxu1 %v1314_v30 }
 0xa76   : > { %2204 = vmatprep.subr.mxu1 %v2485_v8 }
 0xa77   : > { %2205 = vmatpush3.msra.mxu1 %v1313_v31 }
 0xa78   : > { %2206 = vmatprep.subr.mxu1 %v2485_v8 }
 0xa79   : > { %2207 = vmatpush3.msra.mxu1 %v1312_v32 }
 0xa7a   : > { %2208 = vmatprep.subr.mxu1 %v2485_v8 }
 0xa7b   : > { %2209 = vmatpush3.msra.mxu1 %v1311_v33 }
 0xa7c   : > { %2248 = vmatprep.subr.mxu1 %v2485_v8 }
 0xb1c   : > { %v1198_v4 = vpop.f32.mrf.mxu1 }
 0xb1d   : > { %v1199_v5 = vadd.f32 %v1725_v3, %v1198_v4  ;;  %v1526_v3 = vld [vmem:[%s3007_s9 + $0x68] sm:$0xff]  ;;  %v1525_v4 = vld [vmem:[%s3007_s9 + $0x60] sm:$0xff] }
 0xb1e   : > { %v2142_v6 = vpop.f32.mrf.mxu1 }
 0xb1f   : > { %v1202_v7 = vmax.f32 %v1199_v5, 0.0  ;;  %v1524_v5 = vld [vmem:[%s3007_s9 + $0x58] sm:$0xff]  ;;  %v1523_v6 = vld [vmem:[%s3007_s9 + $0x50] sm:$0xff] }
 0xb21   : > { %2176 = vmatmul.mubr.f32.vlgmr.msra.gmra.mxu0 %v1202_v7 }
 0xb22   : > { %2245 = vmatprep.mubr.msk.f32.mxu0 %vm2486_vm1, %v2485_v8  ;;  %2214 = vmatpush3.msra.mxu0 %v1422_v34 }
 0xb23   : > { %2215 = vmatprep.subr.mxu0 %v2485_v8 }
 0xb24   : > { %2216 = vmatpush3.msra.mxu0 %v1421_v35 }
 0xb25   : > { %2217 = vmatprep.subr.mxu0 %v2485_v8 }
 0xb26   : > { %2218 = vmatpush3.msra.mxu0 %v1420_v36 }
 0xb27   : > { %2219 = vmatprep.subr.mxu0 %v2485_v8 }
 0xb28   : > { %2220 = vmatpush3.msra.mxu0 %v1419_v37 }
 0xb29   : > { %2221 = vmatprep.subr.mxu0 %v2485_v8 }
 0xb2a   : > { %2222 = vmatpush3.msra.mxu0 %v1418_v38 }
 0xb2b   : > { %2223 = vmatprep.subr.mxu0 %v2485_v8 }
 0xb2c   : > { %2224 = vmatpush3.msra.mxu0 %v1417_v39 }
 0xb2d   : > { %2225 = vmatprep.subr.mxu0 %v2485_v8 }
 0xb2e   : > { %2226 = vmatpush3.msra.mxu0 %v1416_v40 }
 0xb2f   : > { %2227 = vmatprep.subr.mxu0 %v2485_v8 }
 0xb30   : > { %2228 = vmatpush3.msra.mxu0 %v1415_v41 }
 0xb31   : > { %2229 = vmatprep.subr.mxu0 %v2485_v8 }
 0xb32   : > { %2230 = vmatpush3.msra.mxu0 %v1414_v42 }
 0xb33   : > { %2231 = vmatprep.subr.mxu0 %v2485_v8 }
 0xb34   : > { %2232 = vmatpush3.msra.mxu0 %v1413_v43 }
 0xb35   : > { %2233 = vmatprep.subr.mxu0 %v2485_v8 }
 0xb36   : > { %2234 = vmatpush3.msra.mxu0 %v1412_v44 }
 0xb37   : > { %2235 = vmatprep.subr.mxu0 %v2485_v8 }
 0xb38   : > { %2236 = vmatpush3.msra.mxu0 %v1411_v45 }
 0xb39   : > { %2237 = vmatprep.subr.mxu0 %v2485_v8 }
 0xb3a   : > { %2238 = vmatpush3.msra.mxu0 %v1410_v46 }
 0xb3b   : > { %2239 = vmatprep.subr.mxu0 %v2485_v8 }
 0xb3c   : > { %2240 = vmatpush3.msra.mxu0 %v1409_v52 }
 0xb3d   : > { %2241 = vmatprep.subr.mxu0 %v2485_v8 }
 0xb3e   : > { %2242 = vmatpush3.msra.mxu0 %v1408_v53 }
 0xb3f   : > { %2243 = vmatprep.subr.mxu0 %v2485_v8 }
 0xb40   : > { %2244 = vmatpush3.msra.mxu0 %v1407_v54 }
 0xbe1   : > { %v1294_v10 = vpop.f32.mrf.mxu0 }
 0xbe2   : > { %v1295_v11 = vadd.f32 %v1727_v9, %v1294_v10 }
 0xbe3   : > { %v2177_v12 = vpop.f32.mrf.mxu0 }
 0xbe4   : > { %v1298_v13 = vmax.f32 %v1295_v11, 0.0  ;;  %v1522_v12 = vld [vmem:[%s3007_s9 + $0x48] sm:$0xff] }
 0xbe6   : > { %1299 = vadd.xlane.f32.xlu0 %v1298_v13 }
 0xc6f   : > { %v1300_v20 = vpop.xlane.xlu0 %1299 }
 0xc70   : > { %v1301_v21 = vmul.f32 0.0078125, %v1300_v20  ;;  %v1514_v20 = vld [vmem:[%s3007_s9 + $0x8] sm:$0xff] }
 0xc72   : > { %v2853_v22 = vsub.f32 %v1298_v13, %v1301_v21  ;;  %v1521_v13 = vld [vmem:[%s3007_s9 + $0x40] sm:$0xff] }
 0xc73   : > { %v1513_v21 = vld [vmem:[%s3007_s9] sm:$0xff] }
 0xc74   : > { %v1303_v23 = vmul.f32 %v2853_v22, %v2853_v22 }
 0xc76   : > { %1304 = vadd.xlane.f32.xlu1 %v1303_v23 }
 0xcff   : > { %v1305_v47 = vpop.xlane.xlu1 %1304 }
 0xd00   : > { %v1306_v48 = vmul.f32 0.0078125, %v1305_v47 }
 0xd02   : > { %v1307_v49 = vadd.f32 1e-05, %v1306_v48 }
 0xd04   : > { %2355 = vrsqrt.f32 %v1307_v49 }
 0xd11   : > { %v2356_v50 = vpop.eup %2355 }
 0xd12   : > { %v1309_v51 = vmul.f32 %v2356_v50, %v2853_v22 }
 0xd14   : > { %2211 = vmatmul.mubr.f32.vlgmr.msra.gmra.mxu1 %v1309_v51 }
 0xd15   : > { %2280 = vmatprep.mubr.msk.f32.mxu1 %vm2486_vm1, %v2485_v8  ;;  %2249 = vmatpush3.msra.mxu1 %v1528_v1 }
 0xd16   : > { %2250 = vmatprep.subr.mxu1 %v2485_v8 }
 0xd17   : > { %2251 = vmatpush3.msra.mxu1 %v1527_v2 }
 0xd18   : > { %2252 = vmatprep.subr.mxu1 %v2485_v8 }
 0xd19   : > { %2253 = vmatpush3.msra.mxu1 %v1526_v3 }
 0xd1a   : > { %2254 = vmatprep.subr.mxu1 %v2485_v8 }
 0xd1b   : > { %2255 = vmatpush3.msra.mxu1 %v1525_v4 }
 0xd1c   : > { %2256 = vmatprep.subr.mxu1 %v2485_v8 }
 0xd1d   : > { %2257 = vmatpush3.msra.mxu1 %v1524_v5 }
 0xd1e   : > { %2258 = vmatprep.subr.mxu1 %v2485_v8 }
 0xd1f   : > { %2259 = vmatpush3.msra.mxu1 %v1523_v6 }
 0xd20   : > { %2260 = vmatprep.subr.mxu1 %v2485_v8 }
 0xd21   : > { %2261 = vmatpush3.msra.mxu1 %v1522_v12 }
 0xd22   : > { %2262 = vmatprep.subr.mxu1 %v2485_v8 }
 0xd23   : > { %2263 = vmatpush3.msra.mxu1 %v1521_v13 }
 0xd24   : > { %2264 = vmatprep.subr.mxu1 %v2485_v8 }
 0xd25   : > { %2265 = vmatpush3.msra.mxu1 %v1520_v14 }
 0xd26   : > { %2266 = vmatprep.subr.mxu1 %v2485_v8 }
 0xd27   : > { %2267 = vmatpush3.msra.mxu1 %v1519_v15 }
 0xd28   : > { %2268 = vmatprep.subr.mxu1 %v2485_v8 }
 0xd29   : > { %2269 = vmatpush3.msra.mxu1 %v1518_v16 }
 0xd2a   : > { %2270 = vmatprep.subr.mxu1 %v2485_v8 }
 0xd2b   : > { %2271 = vmatpush3.msra.mxu1 %v1517_v17 }
 0xd2c   : > { %2272 = vmatprep.subr.mxu1 %v2485_v8 }
 0xd2d   : > { %2273 = vmatpush3.msra.mxu1 %v1516_v18 }
 0xd2e   : > { %2274 = vmatprep.subr.mxu1 %v2485_v8 }
 0xd2f   : > { %2275 = vmatpush3.msra.mxu1 %v1515_v19 }
 0xd30   : > { %2276 = vmatprep.subr.mxu1 %v2485_v8 }
 0xd31   : > { %2277 = vmatpush3.msra.mxu1 %v1514_v20 }
 0xd32   : > { %2278 = vmatprep.subr.mxu1 %v2485_v8 }
 0xd33   : > { %2279 = vmatpush3.msra.mxu1 %v1513_v21 }
 0xdd4   : > { %v1401_v56 = vpop.f32.mrf.mxu1 }
 0xdd5   : > { %v1402_v57 = vadd.f32 %v1729_v55, %v1401_v56 }
 0xdd6   : > { %v2212_v58 = vpop.f32.mrf.mxu1 }
 0xdd7   : > { %v1405_v59 = vmax.f32 %v1402_v57, 0.0 }
 0xdd9   : > { %2246 = vmatmul.mubr.f32.vlgmr.msra.gmra.mxu0 %v1405_v59 }
 0xe99   : > { %v1497_v61 = vpop.f32.mrf.mxu0 }
 0xe9a   : > { %v1498_v62 = vadd.f32 %v1731_v60, %v1497_v61 }
 0xe9b   : > { %v2247_v63 = vpop.f32.mrf.mxu0 }
 0xe9c   : > { %v1501_v0 = vmax.f32 %v1498_v62, 0.0 }
 0xe9e   : > { %1502 = vadd.xlane.f32.xlu0 %v1501_v0 }
 0xf27   : > { %v1503_v7 = vpop.xlane.xlu0 %1502 }
 0xf28   : > { %v1504_v9 = vmul.f32 0.0078125, %v1503_v7 }
 0xf2a   : > { %v1505_v10 = vsub.f32 %v1501_v0, %v1504_v9 }
 0xf2c   : > { %v1506_v11 = vmul.f32 %v1505_v10, %v1505_v10 }
 0xf2e   : > { %1507 = vadd.xlane.f32.xlu1 %v1506_v11 }
 0xfb7   : > { %v1508_v22 = vpop.xlane.xlu1 %1507 }
 0xfb8   : > { %v1509_v23 = vmul.f32 0.0078125, %v1508_v22 }
 0xfba   : > { %v1510_v24 = vadd.f32 1e-05, %v1509_v23 }
 0xfbc   : > { %2357 = vrsqrt.f32 %v1510_v24 }
 0xfc9   : > { %v2358_v25 = vpop.eup %2357 }
 0xfca   : > { %v1512_v26 = vmul.f32 %v2358_v25, %v1505_v10 }
 0xfcc   : > { %2281 = vmatmul.mubr.f32.vlgmr.msra.gmra.mxu1 %v1512_v26 }
0x108c   : > { %v1602_v28 = vpop.f32.mrf.mxu1 }
0x108d   : > { %v1603_v8 = vadd.f32 %v1732_v27, %v1602_v28 }
0x108e   : > { %v2282_v29 = vpop.f32.mrf.mxu1 }
0x108f   : > { %1606 = vst.msk [vmem:[%s407_s16] sm:$0xff] %vm413_vm0, %v1603_v8 }
0x1090   : > { %2424 = shalt.err (!%p2421_p3)
}
0x1091   : > { %s2425_s30 = scalar_lea.hbm %s2962_s29, 128  ;;  %s2429_s16 = scalar_lea.hbm %s3009_s11, 256 }
0x1092   : > { %p2426_p2 = scmp.ne.s32.totalorder %s2962_s29, %s2425_s30  ;;  %p2430_p7 = scmp.lt.s32.totalorder %s2962_s29, %s3009_s11 }
0x1093   : > { %p2431_p6 = scmp.lt.s32.totalorder %s2429_s16, %s2425_s30 }
0x1094   : > { %p2427_p4 = pnand %p2426_p2, %p2586_p5 }
0x1095   : > { %p2432_p9 = por %p2431_p6, %p2430_p7 }
0x1096   : > { %p2428_p13 = pneg %p2427_p4 }
0x1098   : > { %p2433_p10 = pnand %p2432_p9, %p2428_p13 }
0x109a   : > { %2436 = shalt.err (!%p2433_p10)
}
0x109b   : > { %2291 = dma.vmem_to_hbm [thread:$0]  (%p2586_p5), %s1622_s26, 128, %s2962_s29, %s1608_s15  }
0x109c PF: > { %p2308_p12 = scmp.ge.s32.totalorder %s2479_s20, 2  ;;  %s1633_s0 = sand.u32 1, %s2467_s17  }
0x109d   : > { %p3022_p8 = scmp.ne.s32.totalorder %s3014_s28, 0  ;;  %s1634_s21 = scalar_lea.sflag [#allocation4], %s1633_s0 }
0x109f   : > { %p2301_p11 = pnand %p2308_p12, %p3022_p8 }
0x10a1   : > { %p2302_p0 = pneg %p2301_p11 }
0x10a3   : > { %2462 = dma.done.wait (%p2302_p0), %s1634_s21, 128  }
0x10a4   : > { %2464 = vsyncadd (%p2302_p0), %s1634_s21, 4294967168  ;;  %s3023_s24 = sld [smem:[#allocation11_spill]]  ;;  %p23_p1 = scmp.ge.s32.totalorder %s2573_s23, 4  }
0x10a5   : > { %s3024_s17 = smov %s2471_s18  ;;  %s3025_s18 = smov %s2475_s19 }
0x10a6   : > { %s3027_s20 = smov %s2573_s23  ;;  %25 = sbr.rel (!%p23_p1) target bundleno = 7 (0x7), region = 122 }
0x10aa   : > { %s3026_s19 = smov %s3023_s24 }
0x10ab   :  { %1639 = vsyncpa [#allocation3], 1 }
0x10ac   :  { %1641 = vsyncpa [#allocation3 + $0x1], 1 }
0x10ad   :  { %1642 = vsyncpa [#allocation6], 1 }
0x10ae   :  { %1643 = vsyncpa [#allocation4], 1 }
0x10af   :  { %1645 = vsyncpa [#allocation4 + $0x1], 1 }

</bundles_post_ra>
